<compile_context>
chip_gen: v7x
topology: tpu7x:2x2x1
jax: 0.10.0
libtpu: 0.0.40
codegen_flags: <defaults>
</compile_context>

<pallas_src>
import functools

import jax
import jax.numpy as jnp
import numpy as np
from jax import lax
from jax.experimental import pallas as pl
from jax.experimental.pallas import tpu as pltpu

LANES = 128


def _round_up(x, m):
    return (x + m - 1) // m * m


# --------------------------------------------------------------------------
# Fused kernel: one-hot @ (embed·conv) -> shift-add conv -> ReLU -> masked
# max/mean pool -> |a-b|, a*b -> FC1+ReLU -> FC2 -> sigmoid
# --------------------------------------------------------------------------
def _textcnn_kernel(ids_ref, fused_ref, consts_ref, fcw_ref, out_ref,
                    *, TB, N, KMAX, VOCABP):
    rows = 2 * TB * N          # sentence-1 rows of the TB samples, then sentence-2 rows
    CP = LANES

    # constant slab layout (all row offsets are multiples of 8 since N % 8 == 0):
    #   [0, N)        mask for the max-pool lanes   (1.0 at valid conv positions)
    #   [N, 2N)       mask for the avg-pool lanes   (1/L at valid conv positions)
    #   row 2N        conv bias (duplicated into the avg lanes)
    #   row 2N + 8    FC1 bias
    #   row 2N + 16   FC2 bias
    mask_max = consts_ref[0:N, :]
    mask_avg = consts_ref[N:2 * N, :]
    cbias = consts_ref[2 * N:2 * N + 1, :]
    b1 = consts_ref[2 * N + 8:2 * N + 9, :]
    b2 = consts_ref[2 * N + 16:2 * N + 17, :]

    # ---- embedding + every tap of every conv branch in ONE MXU matmul ---------------
    # the embedding table was folded into the conv slab offline, so the contraction
    # depth is VOCABP (>=128) instead of embed_dim.  One-hot values are exact in bf16.
    # NOTE: out-of-range / negative ids silently produce a zero embedding row
    # (PyTorch nn.Embedding would raise); fine for trusted inputs.
    ids = ids_ref[...]                                                # (rows, 1) int32
    hot = jnp.where(
        ids == lax.broadcasted_iota(jnp.int32, (rows, VOCABP), 1),
        1.0, 0.0).astype(jnp.bfloat16)                                # (rows, VOCABP)
    z = jnp.dot(hot, fused_ref[...],
                preferred_element_type=jnp.float32)                   # (rows, KMAX*128)

    # ---- Conv1d = shift-and-add of the per-tap 128-lane slabs ------------------------
    # pltpu.roll is an XLU sublane rotate on a lane-aligned slab (no misaligned slices,
    # no VMEM scratch).  Wrapped / cross-sentence rows only land at positions >= L,
    # which the pooling masks zero out (and act >= 0 after ReLU, so a zeroed position
    # can never win the max-pool).  conv[p] += z_k[p + k].
    conv = z[:, 0:CP]
    for k in range(1, KMAX):
        conv = conv + pltpu.roll(z[:, k * CP:(k + 1) * CP],
                                 shift=rows - k, axis=0)
    act = jnp.maximum(conv + cbias, 0.0)                              # bias + ReLU, (rows, 128)

    # ---- masked global max / mean pooling (vectorized, no scratch) -------------------
    act3 = act.reshape(2 * TB, N, CP)                                 # N % 8 == 0 -> layout-free
    feats = (jnp.max(act3 * mask_max[None, :, :], axis=1)             # max lanes [0, C)
             + jnp.sum(act3 * mask_avg[None, :, :], axis=1))          # mean lanes [C, 2C)

    fa = feats[0:TB, :]                                               # sentence-1 features
    fb = feats[TB:2 * TB, :]                                          # sentence-2 features

    # ---- head: |a-b|, a*b -> FC1 + ReLU -> FC2 -> sigmoid ----------------------------
    # TODO(synk): Dropout(0.5) layers are identity at inference; forward-only kernel.
    d = jnp.concatenate([jnp.abs(fa - fb), fa * fb], axis=-1)         # (TB, 256)
    w1 = fcw_ref[0:2 * LANES, :]                                      # bf16, (256, 128)
    w2 = fcw_ref[2 * LANES:3 * LANES, :]                              # bf16, (128, 128)
    h = jnp.maximum(
        jnp.dot(d.astype(jnp.bfloat16), w1,
                preferred_element_type=jnp.float32) + b1, 0.0)        # (TB, 128)
    o = jnp.dot(h.astype(jnp.bfloat16), w2,
                preferred_element_type=jnp.float32) + b2
    out_ref[...] = 0.5 * (jnp.tanh(0.5 * o) + 1.0)                    # stable sigmoid


# --------------------------------------------------------------------------
# Offline weight packing (done once at load time in a real deployment)
# --------------------------------------------------------------------------
def _packed_weights(params, N):
    conv_w, conv_b = params["conv_w"], params["conv_b"]
    Ks = [int(w.shape[0]) for w in conv_w]
    Cos = [int(w.shape[2]) for w in conv_w]
    V = int(conv_w[0].shape[1])
    KMAX = max(Ks)
    C = sum(Cos)
    assert 2 * C <= LANES, "max+avg feature lanes must fit in 128"
    assert N % 8 == 0     # keeps pooling reshape / mask slices sublane-aligned
    offs = np.concatenate([[0], np.cumsum(Cos)[:-1]]).astype(int)

    # tap-major conv weights, columns duplicated for the avg-pool copy
    w_all = np.zeros((V, KMAX * LANES), np.float32)
    cbias = np.zeros((LANES,), np.float32)
    mask_max = np.zeros((N, LANES), np.float32)
    mask_avg = np.zeros((N, LANES), np.float32)   # carries the 1/L factor
    for b, (w, bias) in enumerate(zip(conv_w, conv_b)):
        w = np.asarray(w, np.float32)
        bias = np.asarray(bias, np.float32)
        K_b, _, Co_b = w.shape
        off = int(offs[b])
        L = N - K_b + 1
        for k in range(K_b):
            col = k * LANES
            w_all[:, col + off:col + off + Co_b] = w[k]
            w_all[:, col + C + off:col + C + off + Co_b] = w[k]       # avg-pool copy
        cbias[off:off + Co_b] = bias[0]
        cbias[C + off:C + off + Co_b] = bias[0]
        mask_max[:L, off:off + Co_b] = 1.0
        mask_avg[:L, C + off:C + off + Co_b] = 1.0 / L

    # fold the (padded) embedding table into the conv slab -> single in-kernel matmul
    embed = np.asarray(params["embed"], np.float32)
    vocab = embed.shape[0]
    VOCABP = _round_up(vocab, LANES)
    tab_p = np.zeros((VOCABP, V), np.float64)
    tab_p[:vocab] = embed
    fused = (tab_p @ w_all.astype(np.float64)).astype(np.float32)     # (VOCABP, KMAX*128)

    # single constant slab (masks + all biases), 8-aligned row offsets
    consts = np.zeros((2 * N + 24, LANES), np.float32)
    consts[0:N] = mask_max
    consts[N:2 * N] = mask_avg
    consts[2 * N] = cbias
    w1a = np.asarray(params["w1a"], np.float32)                       # (2C, H) - delta1 half
    w1b = np.asarray(params["w1b"], np.float32)                       # (2C, H) - delta2 half
    b1 = np.asarray(params["b1"], np.float32)
    w2 = np.asarray(params["w2"], np.float32)                         # (H, 1)
    b2 = np.asarray(params["b2"], np.float32)
    H = w1a.shape[1]
    consts[2 * N + 8, :H] = b1[0]
    consts[2 * N + 16, 0] = b2[0, 0]

    # single FC weight slab: rows [0,128)=W1(delta1), [128,256)=W1(delta2), [256,384)=W2
    fcw = np.zeros((3 * LANES, LANES), np.float32)
    fcw[0:2 * C, :H] = w1a
    fcw[LANES:LANES + 2 * C, :H] = w1b
    fcw[2 * LANES:2 * LANES + H, 0] = w2[:, 0]

    return dict(
        fused=jnp.asarray(fused).astype(jnp.bfloat16),                # bf16 MXU operands
        consts=jnp.asarray(consts),                                   # f32 (VPU math)
        fcw=jnp.asarray(fcw).astype(jnp.bfloat16),
        KMAX=KMAX, VOCABP=VOCABP)


# --------------------------------------------------------------------------
# Forward wrapper
# --------------------------------------------------------------------------
def textcnn_forward(x_idx, params, *, block_batch=64):
    """x_idx: (n, 2, N) int token ids -> (n,) sigmoid scores."""
    n, two, N = x_idx.shape
    assert two == 2
    # TODO(synk): if doc_length is not a multiple of 8, pad the sequence (the extra
    # positions are naturally excluded by the valid-length pooling masks).
    assert N % 8 == 0

    pk = _packed_weights(params, N)
    KMAX, VOCABP = pk["KMAX"], pk["VOCABP"]

    # samples per grid step; multiple of 8.  Cap TB ~128-256 on v7x (64 MiB VMEM) and
    # keep the number of grid blocks >= 2 / even so both TensorCores get work.
    TB = min(int(block_batch), _round_up(n, 8))
    TB = max(8, (TB // 8) * 8)
    nb = (n + TB - 1) // TB
    n_pad = nb * TB
    if n_pad != n:
        pad = jnp.zeros((n_pad - n, 2, N), x_idx.dtype)
        x_idx = jnp.concatenate([x_idx, pad], axis=0)
    x_idx = x_idx.astype(jnp.int32)
    # per grid block: TB*N sentence-1 rows followed by TB*N sentence-2 rows
    ids = (x_idx.reshape(nb, TB, 2, N)
           .transpose(0, 2, 1, 3)
           .reshape(nb * 2 * TB * N, 1))

    rows = 2 * TB * N
    kern = functools.partial(_textcnn_kernel, TB=TB, N=N, KMAX=KMAX, VOCABP=VOCABP)

    out = pl.pallas_call(
        kern,
        out_shape=jax.ShapeDtypeStruct((n_pad, LANES), jnp.float32),
        grid=(nb,),
        in_specs=[
            pl.BlockSpec((rows, 1), lambda i: (i, 0)),                # token ids (both sents)
            pl.BlockSpec((VOCABP, KMAX * LANES), lambda i: (0, 0)),   # embed·conv fused slab
            pl.BlockSpec((2 * N + 24, LANES), lambda i: (0, 0)),      # masks + biases
            pl.BlockSpec((3 * LANES, LANES), lambda i: (0, 0)),       # FC weights
        ],
        out_specs=pl.BlockSpec((TB, LANES), lambda i: (i, 0)),
        compiler_params=pltpu.CompilerParams(
            dimension_semantics=("parallel",),
            # 32 MiB covers TB up to ~128 everywhere; raise further for larger TB
            # (v5e default scoped VMEM is only 16 MiB).
            vmem_limit_bytes=32 * 1024 * 1024),
    )(ids, pk["fused"], pk["consts"], pk["fcw"])

    return out[:n, 0]                                                 # prediction is in lane 0


# --------------------------------------------------------------------------
# Pure-JAX reference (f32, no Pallas) for the correctness check
# --------------------------------------------------------------------------
def reference_forward(x_idx, params):
    n, _, N = x_idx.shape
    emb = params["embed"][x_idx].astype(jnp.float32)                  # (n, 2, N, V)

    def branch(xs, w, b):                                             # xs: (m, N, V)
        K, _, Co = w.shape
        L = N - K + 1
        acc = jnp.zeros((xs.shape[0], L, Co), jnp.float32)
        for k in range(K):
            acc = acc + jnp.einsum("btv,vc->btc", xs[:, k:k + L, :], w[k])
        acc = jnp.maximum(acc + b[None, :, :], 0.0)
        return acc.max(axis=1), acc.mean(axis=1)

    def sent_feats(xs):
        mxs, avs = [], []
        for w, b in zip(params["conv_w"], params["conv_b"]):
            mx, av = branch(xs, w, b)
            mxs.append(mx)
            avs.append(av)
        return jnp.concatenate(mxs + avs, axis=1)

    out11 = sent_feats(emb[:, 0])
    out12 = sent_feats(emb[:, 1])
    d1 = jnp.abs(out11 - out12)
    d2 = out11 * out12
    h = jnp.maximum(d1 @ params["w1a"] + d2 @ params["w1b"] + params["b1"], 0.0)
    o = h @ params["w2"] + params["b2"]
    return jax.nn.sigmoid(o).reshape(-1)


# --------------------------------------------------------------------------
# Deterministic parameter construction (shapes from TextCNN.__init__)
# --------------------------------------------------------------------------
def make_params(key, vocab_size, V, Co, Ks, fc_hiddim):
    keys = jax.random.split(key, 3 + 2 * len(Co) + 4)
    ki = iter(keys)

    embed = jax.random.normal(next(ki), (vocab_size, V), jnp.float32) * 0.1

    conv_w, conv_b = [], []
    for co, k in zip(Co, Ks):
        fan_in, fan_out = V * k, co * k
        std = np.sqrt(2.0 / (fan_in + fan_out))                       # xavier_normal_
        w_torch = jax.random.normal(next(ki), (co, V, k), jnp.float32) * std
        conv_w.append(jnp.transpose(w_torch, (2, 1, 0)))              # (K, V, Co)
        conv_b.append(jax.random.normal(next(ki), (1, co), jnp.float32) * 0.01)

    F2 = 2 * sum(Co)                                                  # per-sentence feature dim
    in_dim = 2 * F2                                                   # sum(Co)*4*kmax, kmax=1
    std1 = np.sqrt(2.0 / (in_dim + fc_hiddim))
    w1 = (jax.random.normal(next(ki), (fc_hiddim, in_dim), jnp.float32) * std1).T
    b1 = jax.random.normal(next(ki), (1, fc_hiddim), jnp.float32) * 0.01
    std2 = np.sqrt(2.0 / (fc_hiddim + 1))
    w2 = (jax.random.normal(next(ki), (1, fc_hiddim), jnp.float32) * std2).T
    b2 = jax.random.normal(next(ki), (1, 1), jnp.float32) * 0.01

    return {
        "embed": embed,
        "conv_w": conv_w,
        "conv_b": conv_b,
        "w1a": w1[:F2, :],       # multiplies delta1 (first half of the concat)
        "w1b": w1[F2:, :],       # multiplies delta2 (second half of the concat)
        "b1": b1,
        "w2": w2,
        "b2": b2,
    }


if __name__ == "__main__":
    # small, forward-consistent config
    n = 16                   # batch
    N = 16                   # doc_length
    V = 32                   # embed_dim
    vocab_size = 50
    Co = [8, 8, 8, 8, 8]     # kernel_num
    Ks = [1, 2, 3, 4, 5]     # kernel_size
    fc_hiddim = 32
    # kmax = 1 (pools cover the full conv length, matching the fc input dim)

    key = jax.random.PRNGKey(0)
    pkey, xkey = jax.random.split(key)
    params = make_params(pkey, vocab_size, V, Co, Ks, fc_hiddim)

    # input: integer token ids, shape (n, 2, N)   (sta_feat is None -> no idx column)
    x_idx = jax.random.randint(xkey, (n, 2, N), 0, vocab_size, dtype=jnp.int32)

    out = textcnn_forward(x_idx, params, block_batch=8)    # 2 grid steps at n=16
    out = jax.block_until_ready(out)

    ref = reference_forward(x_idx, params)
    # bf16 MXU operands with f32 accumulation vs. pure-f32 reference
    np.testing.assert_allclose(np.asarray(out), np.asarray(ref), atol=1e-2, rtol=1e-2)

    print("KERNEL_OK")
</pallas_src>

<mosaic_0001>
module attributes {stable_mosaic.version = 11 : i64} {
  func.func @_textcnn_kernel(%arg0: i32, %arg1: memref<256x1xi32, #tpu.memory_space<vmem>>, %arg2: memref<128x640xbf16, #tpu.memory_space<vmem>>, %arg3: memref<56x128xf32, #tpu.memory_space<vmem>>, %arg4: memref<384x128xbf16, #tpu.memory_space<vmem>>, %arg5: memref<8x128xf32, #tpu.memory_space<vmem>>) attributes {dimension_semantics = [#tpu.dimension_semantics<parallel>], iteration_bounds = array<i64: 2>, scalar_prefetch = 0 : i64, scratch_operands = 0 : i64, tpu.core_type = #tpu.core_type<tc>, window_params = [{transform_indices = @transform_0, window_bounds = array<i64: 256, 1>}, {pipeline_mode = #tpu.pipeline_mode<synchronous>, transform_indices = @transform_1, window_bounds = array<i64: 128, 640>}, {pipeline_mode = #tpu.pipeline_mode<synchronous>, transform_indices = @transform_2, window_bounds = array<i64: 56, 128>}, {pipeline_mode = #tpu.pipeline_mode<synchronous>, transform_indices = @transform_3, window_bounds = array<i64: 384, 128>}, {transform_indices = @transform_4, window_bounds = array<i64: 8, 128>}]} {
    %c0 = arith.constant 0 : index
    %c0_0 = arith.constant 0 : index
    %0 = vector.load %arg3[%c0, %c0_0] : memref<56x128xf32, #tpu.memory_space<vmem>>, vector<16x128xf32>
    %c16 = arith.constant 16 : index
    %c0_1 = arith.constant 0 : index
    %1 = vector.load %arg3[%c16, %c0_1] : memref<56x128xf32, #tpu.memory_space<vmem>>, vector<16x128xf32>
    %c32 = arith.constant 32 : index
    %c0_2 = arith.constant 0 : index
    %2 = vector.load %arg3[%c32, %c0_2] : memref<56x128xf32, #tpu.memory_space<vmem>>, vector<1x128xf32>
    %c40 = arith.constant 40 : index
    %c0_3 = arith.constant 0 : index
    %3 = vector.load %arg3[%c40, %c0_3] : memref<56x128xf32, #tpu.memory_space<vmem>>, vector<1x128xf32>
    %c48 = arith.constant 48 : index
    %c0_4 = arith.constant 0 : index
    %4 = vector.load %arg3[%c48, %c0_4] : memref<56x128xf32, #tpu.memory_space<vmem>>, vector<1x128xf32>
    %c0_5 = arith.constant 0 : index
    %c0_6 = arith.constant 0 : index
    %5 = vector.load %arg1[%c0_5, %c0_6] : memref<256x1xi32, #tpu.memory_space<vmem>>, vector<256x1xi32>
    %6 = tpu.iota {dimensions = array<i32: 1>} : vector<256x128xi32>
    %7 = vector.broadcast %5 : vector<256x1xi32> to vector<256x128xi32>
    %8 = arith.cmpi eq, %7, %6 : vector<256x128xi32>
    %cst = arith.constant 1.000000e+00 : f32
    %cst_7 = arith.constant 0.000000e+00 : f32
    %9 = vector.broadcast %cst : f32 to vector<256x128xf32>
    %10 = vector.broadcast %cst_7 : f32 to vector<256x128xf32>
    %11 = arith.select %8, %9, %10 : vector<256x128xi1>, vector<256x128xf32>
    %12 = arith.truncf %11 : vector<256x128xf32> to vector<256x128xbf16>
    %c0_8 = arith.constant 0 : index
    %c0_9 = arith.constant 0 : index
    %13 = vector.load %arg2[%c0_8, %c0_9] : memref<128x640xbf16, #tpu.memory_space<vmem>>, vector<128x640xbf16>
    %cst_10 = arith.constant dense<0.000000e+00> : vector<256x640xf32>
    %14 = tpu.matmul %12, %13, %cst_10 {dimension_numbers = #tpu.dot_dimension_numbers<[1], [0], [0], [1], [0, 0, 1, 1], [], []>} : vector<256x128xbf16>, vector<128x640xbf16>, vector<256x640xf32> -> vector<256x640xf32>
    %15 = vector.extract_strided_slice %14 {offsets = [0, 0], sizes = [256, 128], strides = [1, 1]} : vector<256x640xf32> to vector<256x128xf32>
    %16 = vector.extract_strided_slice %14 {offsets = [0, 128], sizes = [256, 128], strides = [1, 1]} : vector<256x640xf32> to vector<256x128xf32>
    %c255_i32 = arith.constant 255 : i32
    %17 = tpu.dynamic_rotate %16 by %c255_i32 dim 0 : vector<256x128xf32>, i32 -> vector<256x128xf32>
    %18 = arith.addf %15, %17 : vector<256x128xf32>
    %19 = vector.extract_strided_slice %14 {offsets = [0, 256], sizes = [256, 128], strides = [1, 1]} : vector<256x640xf32> to vector<256x128xf32>
    %c254_i32 = arith.constant 254 : i32
    %20 = tpu.dynamic_rotate %19 by %c254_i32 dim 0 : vector<256x128xf32>, i32 -> vector<256x128xf32>
    %21 = arith.addf %18, %20 : vector<256x128xf32>
    %22 = vector.extract_strided_slice %14 {offsets = [0, 384], sizes = [256, 128], strides = [1, 1]} : vector<256x640xf32> to vector<256x128xf32>
    %c253_i32 = arith.constant 253 : i32
    %23 = tpu.dynamic_rotate %22 by %c253_i32 dim 0 : vector<256x128xf32>, i32 -> vector<256x128xf32>
    %24 = arith.addf %21, %23 : vector<256x128xf32>
    %25 = vector.extract_strided_slice %14 {offsets = [0, 512], sizes = [256, 128], strides = [1, 1]} : vector<256x640xf32> to vector<256x128xf32>
    %c252_i32 = arith.constant 252 : i32
    %26 = tpu.dynamic_rotate %25 by %c252_i32 dim 0 : vector<256x128xf32>, i32 -> vector<256x128xf32>
    %27 = arith.addf %24, %26 : vector<256x128xf32>
    %28 = vector.broadcast %2 : vector<1x128xf32> to vector<256x128xf32>
    %29 = arith.addf %27, %28 : vector<256x128xf32>
    %cst_11 = arith.constant 0.000000e+00 : f32
    %30 = vector.broadcast %cst_11 : f32 to vector<256x128xf32>
    %31 = arith.maximumf %29, %30 : vector<256x128xf32>
    %32 = vector.shape_cast %31 : vector<256x128xf32> to vector<16x16x128xf32>
    %33 = vector.shape_cast %0 : vector<16x128xf32> to vector<1x16x128xf32>
    %34 = vector.broadcast %33 : vector<1x16x128xf32> to vector<16x16x128xf32>
    %35 = arith.mulf %32, %34 : vector<16x16x128xf32>
    %cst_12 = arith.constant dense<0xFF800000> : vector<16x128xf32>
    %36 = vector.multi_reduction <maximumf>, %35, %cst_12 [1] : vector<16x16x128xf32> to vector<16x128xf32>
    %37 = vector.shape_cast %1 : vector<16x128xf32> to vector<1x16x128xf32>
    %38 = vector.broadcast %37 : vector<1x16x128xf32> to vector<16x16x128xf32>
    %39 = arith.mulf %32, %38 : vector<16x16x128xf32>
    %cst_13 = arith.constant dense<0.000000e+00> : vector<16x128xf32>
    %40 = vector.multi_reduction <add>, %39, %cst_13 [1] : vector<16x16x128xf32> to vector<16x128xf32>
    %41 = arith.addf %36, %40 : vector<16x128xf32>
    %42 = vector.extract_strided_slice %41 {offsets = [0, 0], sizes = [8, 128], strides = [1, 1]} : vector<16x128xf32> to vector<8x128xf32>
    %43 = vector.extract_strided_slice %41 {offsets = [8, 0], sizes = [8, 128], strides = [1, 1]} : vector<16x128xf32> to vector<8x128xf32>
    %44 = arith.subf %42, %43 : vector<8x128xf32>
    %45 = math.absf %44 : vector<8x128xf32>
    %46 = arith.mulf %42, %43 : vector<8x128xf32>
    %47 = tpu.concatenate %45, %46 in 1 : vector<8x128xf32>, vector<8x128xf32> -> vector<8x256xf32>
    %c0_14 = arith.constant 0 : index
    %c0_15 = arith.constant 0 : index
    %48 = vector.load %arg4[%c0_14, %c0_15] : memref<384x128xbf16, #tpu.memory_space<vmem>>, vector<256x128xbf16>
    %c256 = arith.constant 256 : index
    %c0_16 = arith.constant 0 : index
    %49 = vector.load %arg4[%c256, %c0_16] : memref<384x128xbf16, #tpu.memory_space<vmem>>, vector<128x128xbf16>
    %50 = arith.truncf %47 : vector<8x256xf32> to vector<8x256xbf16>
    %cst_17 = arith.constant dense<0.000000e+00> : vector<8x128xf32>
    %51 = tpu.matmul %50, %48, %cst_17 {dimension_numbers = #tpu.dot_dimension_numbers<[1], [0], [0], [1], [0, 0, 1, 1], [], []>} : vector<8x256xbf16>, vector<256x128xbf16>, vector<8x128xf32> -> vector<8x128xf32>
    %52 = vector.broadcast %3 : vector<1x128xf32> to vector<8x128xf32>
    %53 = arith.addf %51, %52 : vector<8x128xf32>
    %cst_18 = arith.constant 0.000000e+00 : f32
    %54 = vector.broadcast %cst_18 : f32 to vector<8x128xf32>
    %55 = arith.maximumf %53, %54 : vector<8x128xf32>
    %56 = arith.truncf %55 : vector<8x128xf32> to vector<8x128xbf16>
    %cst_19 = arith.constant dense<0.000000e+00> : vector<8x128xf32>
    %57 = tpu.matmul %56, %49, %cst_19 {dimension_numbers = #tpu.dot_dimension_numbers<[1], [0], [0], [1], [0, 0, 1, 1], [], []>} : vector<8x128xbf16>, vector<128x128xbf16>, vector<8x128xf32> -> vector<8x128xf32>
    %58 = vector.broadcast %4 : vector<1x128xf32> to vector<8x128xf32>
    %59 = arith.addf %57, %58 : vector<8x128xf32>
    %cst_20 = arith.constant 5.000000e-01 : f32
    %60 = vector.broadcast %cst_20 : f32 to vector<8x128xf32>
    %61 = arith.mulf %60, %59 : vector<8x128xf32>
    %62 = math.tanh %61 : vector<8x128xf32>
    %cst_21 = arith.constant 1.000000e+00 : f32
    %63 = vector.broadcast %cst_21 : f32 to vector<8x128xf32>
    %64 = arith.addf %62, %63 : vector<8x128xf32>
    %cst_22 = arith.constant 5.000000e-01 : f32
    %65 = vector.broadcast %cst_22 : f32 to vector<8x128xf32>
    %66 = arith.mulf %65, %64 : vector<8x128xf32>
    %c0_23 = arith.constant 0 : index
    %c0_24 = arith.constant 0 : index
    %67 = vector.load %arg5[%c0_23, %c0_24] : memref<8x128xf32, #tpu.memory_space<vmem>>, vector<8x128xf32>
    tpu.vector_store %arg5[%c0_23, %c0_24], %66 {strides = array<i32>} : memref<8x128xf32, #tpu.memory_space<vmem>>, vector<8x128xf32>,
    return
  }
  func.func @transform_0(%arg0: i32) -> (i32, i32) {
    %c0_i32 = arith.constant 0 : i32
    %c0_i32_0 = arith.constant 0 : i32
    return %arg0, %c0_i32 : i32, i32
  }
  func.func @transform_1(%arg0: i32) -> (i32, i32) {
    %c0_i32 = arith.constant 0 : i32
    %c0_i32_0 = arith.constant 0 : i32
    %c0_i32_1 = arith.constant 0 : i32
    return %c0_i32, %c0_i32_0 : i32, i32
  }
  func.func @transform_2(%arg0: i32) -> (i32, i32) {
    %c0_i32 = arith.constant 0 : i32
    %c0_i32_0 = arith.constant 0 : i32
    %c0_i32_1 = arith.constant 0 : i32
    return %c0_i32, %c0_i32_0 : i32, i32
  }
  func.func @transform_3(%arg0: i32) -> (i32, i32) {
    %c0_i32 = arith.constant 0 : i32
    %c0_i32_0 = arith.constant 0 : i32
    %c0_i32_1 = arith.constant 0 : i32
    return %c0_i32, %c0_i32_0 : i32, i32
  }
  func.func @transform_4(%arg0: i32) -> (i32, i32) {
    %c0_i32 = arith.constant 0 : i32
    %c0_i32_0 = arith.constant 0 : i32
    return %arg0, %c0_i32 : i32, i32
  }
}

</mosaic_0001>

<bundles_post_ra>
// kernel: tpu_custom_call.1
= control target key start
LH: loop header
LB: loop body
LE: loop exit
PB: predicated region body
PF: predicated region fallthrough
CT: control target
= control target key end

     0   :  { %9 = vsyncpa [#allocation3], 0  ;;  %s4344_s0 = inlined_call_operand.vmem [shape: s32[512,1], index: 0, kind: input, shape index: {}]   ;;  %s4345_s1 = inlined_call_operand.vmem [shape: bf16[128,640], index: 1, kind: input, shape index: {}]   ;;  %s4346_s2 = inlined_call_operand.hbm [shape: f32[56,128], index: 2, kind: input, shape index: {}]   ;;  %s4347_s3 = inlined_call_operand.vmem [shape: bf16[384,128], index: 3, kind: input, shape index: {}]   ;;  %s4348_s4 = inlined_call_operand.hbm [shape: f32[16,128], index: 4, kind: output, shape index: {}]  }
   0x1   :  { %10 = vsyncpa [#allocation4], 0 }
   0x2   :  { %12 = vsyncpa [#allocation4 + $0x1], 0  ;;  %s3001_s15 = smov 0   ;;  %s3003_s16 = smov 0  }
   0x3   :  { %s3005_s17 = smov 0   ;;  %s3007_s18 = smov 0  }
   0x4 LB: > { %s3022_s19 = sadd.s32 4294967295, %s2966_s18   ;;  %s2433_s20 = sadd.s32 4294967294, %s2966_s18   ;;  %s2966_s18 = sphi %s3007_s18, %s4431_s18   ;;  %s2962_s17 = sphi %s3005_s17, %s4430_s17   ;;  %s2958_s16 = sphi %s3003_s16, %s4429_s16   ;;  %s2954_s15 = sphi %s3001_s15, %s4428_s15  }
   0x5   : > { %s3026_s21 = sadd.s32 1, %s2966_s18   ;;  %s114_s22 = sadd.s32 1, %s2962_s17 }
   0x6   : > { %s111_s23 = ssub.s32 %s2966_s18, %s3026_s21  ;;  %p124_p0 = scmp.ne.s32.totalorder %s2962_s17, %s2958_s16 }
   0x7   : > { %p112_p1 = scmp.eq.s32.totalorder %s111_s23, 0  ;;  %p125_p2 = scmp.eq.s32.totalorder %s3022_s19, 1 }
   0x8   : > { %p130_p3 = scmp.ne.s32.totalorder %s2958_s16, %s2954_s15  ;;  %p131_p4 = scmp.eq.s32.totalorder %s2433_s20, 1 }
   0x9   : > { %s3037_s24 = scalar_select %p112_p1, %s2962_s17, %s114_s22  }
   0xa   : > { %p3039_p5 = por %p125_p2, %p124_p0  ;;  %p3043_p6 = por %p131_p4, %p130_p3 }
   0xb   : > { %p2434_p7 = scmp.ge.s32.totalorder %s2966_s18, 1  ;;  %p138_p8 = scmp.lt.s32.totalorder %s2966_s18, 3 }
   0xc   : > { %s4360_s25 = scalar_select %p3039_p5, 1, 0 }
   0xd   : > { %s4361_s26 = scalar_select %p3043_p6, 1, 0 }
   0xe   : > { %p4349_p9 = scmp.eq.s32.totalorder %s3022_s19, 0  ;;  %p3050_p10 = pnand %p2434_p7, %p138_p8 }
   0xf   : > { %s2968_s28 = smov [#allocation2]   ;;  %s2872_s7 = scalar_lea.hbm %s4346_s2, 896 }
  0x10   : > { %s4362_s27 = scalar_select %p3050_p10, 1, 0 }
  0x11   : > { %s153_s29 = sshll.u32 %s2968_s28, 4  ;;  %p2738_p11 = pneg %p3050_p10  ;;  %s154_s29 = int_to_ptr.vmem [resolvable:$true] %s153_s29 }
  0x12   : > { %p2873_p13 = scmp.ne.s32.totalorder %s4346_s2, %s2872_s7  ;;  %p2879_p3 = scmp.lt.u32.totalorder %s2872_s7, %s4346_s2 }
  0x13   : > { %p3058_p12 = pnand %p4349_p9, %p2738_p11 }
  0x15   : > { %p2874_p0 = pneg %p3058_p12 }
  0x17   : > { %p2875_p1 = pnand %p2874_p0, %p2873_p13 }
  0x19   : > { %p2876_p2 = pneg %p2875_p1 }
  0x1b   : > { %p2881_p4 = pnand %p2879_p3, %p2876_p2 }
  0x1d   : > { %2884 = shalt.err (!%p2881_p4)
}
  0x1e   : > { %s2885_s12 = scalar_lea.vmem %s154_s29, 896  ;;  %p2893_p9 = scmp.lt.s32.totalorder %s154_s29, %s154_s29 }
  0x1f   : > { %p2886_p7 = scmp.ne.s32.totalorder %s154_s29, %s2885_s12  ;;  %p2894_p6 = scmp.lt.s32.totalorder %s2885_s12, %s2885_s12 }
  0x21   : > { %p2888_p8 = pnand %p2886_p7, %p2874_p0  ;;  %p2895_p5 = por %p2894_p6, %p2893_p9 }
  0x23   : > { %p2889_p11 = pneg %p2888_p8 }
  0x25   : > { %p2896_p10 = pnand %p2895_p5, %p2889_p11 }
  0x27   : > { %2899 = shalt.err (!%p2896_p10)
}
  0x28   : > { %s2969_s13 = smov 128   ;;  %s2970_s14 = smov 8  }
  0x29   : > { %2741 = dma.hbm_to_vmem [thread:$0]  (!%p3058_p12), %s4346_s2, 896, %s154_s29, [#allocation3], %s2969_s13, %s2969_s13, %s2970_s14  }
  0x2a   : > { %p4364_p13 = scmp.ne.s32.totalorder %s4362_s27, 0 }
  0x2c   : > { %181 = sbr.rel (%p4364_p13) target bundleno = 1140 (0x474), region = 36 }
  0x33   : > { %p4365_p1 = scmp.eq.s32.totalorder %s3022_s19, 0 }
  0x35   : > { %2945 = dma.done.wait (%p4365_p1), [#allocation3], 896   ;;  %p4366_p0 = pmov %p4365_p1 }
  0x36   : > { %s2440_s23 = sshll.u32 %s3022_s19, 5  ;;  %v2971_v0 = vmov 0   ;;  %v2790_v9 = vld [vmem:[%s4345_s1 + $0x4] ss:$20 sps:$4 sm:$0xff]   ;;  %v2792_v10 = vld [vmem:[%s4345_s1] ss:$20 sps:$4 sm:$0xff]  }
  0x37   : > { %2947 = vsyncadd (%p4366_p0), [#allocation3], 4294966400  ;;  %2789 = vset.pattern.permute.xlu1 %v2971_v0  ;;  %2788 = vset.pattern.permute.xlu0 %v2971_v0  ;;  %p208_p5 = scmp.lt.s32.totalorder %s2440_s23, 63  ;;  %v2793_v13 = vld [vmem:[%s4345_s1 + $0xc] ss:$20 sps:$4 sm:$0xff]   ;;  %s2606_s28 = sshll.u32 %s3022_s19, 7 }
  0x38   : > { %719 = vmatprep.mubr.bf16.mxu0 %v2971_v0  ;;  %912 = vmatprep.mubr.bf16.mxu1 %v2971_v0  ;;  %v2795_v14 = vld [vmem:[%s4345_s1 + $0x8] ss:$20 sps:$4 sm:$0xff]   ;;  %v2796_v15 = vld [vmem:[%s4345_s1 + $0x2c] ss:$20 sps:$4 sm:$0xff]   ;;  %v2801_v18 = vld [vmem:[%s4345_s1 + $0x30] ss:$20 sps:$4 sm:$0xff]   ;;  %s4302_s8 = scalar_lea.hbm %s4348_s4, %s2606_s28 }
  0x39   : > { %s4433_s23 = smov (!%p208_p5, %s2440_s23), 63  ;;  %687 = vmatprep.subr.bf16.mxu0 %v2790_v9  ;;  %880 = vmatprep.subr.bf16.mxu1 %v2793_v13  ;;  %v2798_v16 = vld [vmem:[%s4345_s1 + $0x28] ss:$20 sps:$4 sm:$0xff]   ;;  %v2804_v22 = vld [vmem:[%s4345_s1 + $0x50] ss:$20 sps:$4 sm:$0xff]   ;;  %p4426_p9 = scmp.ne.s32.totalorder %s4360_s25, 0 }
  0x3a   : > { %s2441_s27 = sshll.u32 %s4433_s23, 3  ;;  %688 = vmatpush1.bf16.msra.mxu0 %v2792_v10  ;;  %881 = vmatpush1.bf16.msra.mxu1 %v2795_v14  ;;  %v2799_v17 = vld [vmem:[%s4345_s1 + $0x34] ss:$20 sps:$4 sm:$0xff]   ;;  %v2805_v23 = vld [vmem:[%s4345_s1 + $0x5c] ss:$20 sps:$4 sm:$0xff]   ;;  %s204_s23 = sand.u32 1, %s2958_s16  }
  0x3b   : > { %s3092_s30 = scalar_lea.vmem %s4344_s0, %s2441_s27  ;;  %689 = vmatprep.subr.bf16.mxu0 %v2796_v15  ;;  %v2802_v20 = vld [vmem:[%s4345_s1 + $0x54] ss:$20 sps:$4 sm:$0xff]   ;;  %882 = vmatprep.subr.bf16.mxu1 %v2799_v17  ;;  %v2807_v24 = vld [vmem:[%s4345_s1 + $0x58] ss:$20 sps:$4 sm:$0xff]   ;;  %v2808_v25 = vld [vmem:[%s4345_s1 + $0x7c] ss:$20 sps:$4 sm:$0xff]  }
  0x3c   : > { %v223_v1 = vld [vmem:[%s3092_s30 + $0x10] sm:$0xff]  ;;  %v221_v2 = vld [vmem:[%s3092_s30] sm:$0xff]  ;;  %v224_v3 = vld [vmem:[%s3092_s30 + $0x18] sm:$0xff]  ;;  %v2972_v10 = vmov 1.0|1.0   ;;  %s2439_s27 = sshll.u32 %s204_s23, 3 }
  0x3d   : > { %262 = vperm.xlu1 %2789, %v223_v1   ;;  %256 = vperm.xlu0 %2788, %v221_v2   ;;  %v222_v4 = vld [vmem:[%s3092_s30 + $0x8] sm:$0xff]  ;;  %v225_v6 = vld [vmem:[%s3092_s30 + $0x20] sm:$0xff]  ;;  %v228_v7 = vld [vmem:[%s3092_s30 + $0x38] sm:$0xff]  ;;  %s206_s29 = scalar_lea.vmem [#allocation5], %s2439_s27  ;;  %s2975_s19 = smov [#allocation5]  }
  0x3e   : > { %v226_v5 = vld [vmem:[%s3092_s30 + $0x28] sm:$0xff]  ;;  %v227_v8 = vld [vmem:[%s3092_s30 + $0x30] sm:$0xff]  ;;  %v229_v12 = vld [vmem:[%s3092_s30 + $0x40] sm:$0xff]  ;;  %690 = vmatpush1.bf16.msra.mxu0 %v2798_v16  ;;  %883 = vmatpush1.bf16.msra.mxu1 %v2801_v18  ;;  %s2362_s5 = sshll.u32 %s206_s29, 4  ;;  %s2904_s10 = sshll.u32 %s2975_s19, 4  ;;  %s4304_s5 = int_to_ptr.vmem [resolvable:$true] %s2362_s5  ;;  %s2905_s10 = int_to_ptr.vmem [resolvable:$false] %s2904_s10 }
  0x3f   : > { %v230_v11 = vld [vmem:[%s3092_s30 + $0x48] sm:$0xff]  ;;  %v232_v19 = vld [vmem:[%s3092_s30 + $0x58] sm:$0xff]  ;;  %v231_v21 = vld [vmem:[%s3092_s30 + $0x50] sm:$0xff]  ;;  %691 = vmatprep.subr.bf16.mxu0 %v2802_v20  ;;  %884 = vmatprep.subr.bf16.mxu1 %v2805_v23  ;;  %s2900_s9 = scalar_lea.vmem %s4304_s5, 128  ;;  %s2906_s11 = scalar_lea.vmem %s2905_s10, 256 }
  0x40   : > { %v2811_v26 = vld [vmem:[%s4345_s1 + $0x84] ss:$20 sps:$4 sm:$0xff]   ;;  %v234_v27 = vld [vmem:[%s3092_s30 + $0x68] sm:$0xff]  ;;  %v2813_v30 = vld [vmem:[%s4345_s1 + $0x80] ss:$20 sps:$4 sm:$0xff]   ;;  %p2901_p6 = scmp.ne.s32.totalorder %s4304_s5, %s2900_s9  ;;  %p2907_p2 = scmp.lt.s32.totalorder %s4304_s5, %s2905_s10 }
  0x41   : > { %265 = vperm.xlu1 %2789, %v224_v3   ;;  %259 = vperm.xlu0 %2788, %v222_v4   ;;  %v233_v28 = vld [vmem:[%s3092_s30 + $0x60] sm:$0xff]  ;;  %v2810_v29 = vld [vmem:[%s4345_s1 + $0x78] ss:$20 sps:$4 sm:$0xff]   ;;  %v235_v34 = vld [vmem:[%s3092_s30 + $0x70] sm:$0xff]  ;;  %v253_v3 = vlaneseq  ;;  %p2908_p3 = scmp.lt.s32.totalorder %s2906_s11, %s2900_s9 }
  0x42   : > { %692 = vmatpush1.bf16.msra.mxu0 %v2804_v22  ;;  %885 = vmatpush1.bf16.msra.mxu1 %v2807_v24  ;;  %v2814_v31 = vld [vmem:[%s4345_s1 + $0xa4] ss:$20 sps:$4 sm:$0xff]   ;;  %v2817_v32 = vld [vmem:[%s4345_s1 + $0xac] ss:$20 sps:$4 sm:$0xff]   ;;  %v2819_v36 = vld [vmem:[%s4345_s1 + $0xa8] ss:$20 sps:$4 sm:$0xff]   ;;  %p2902_p10 = pnand %p2901_p6, %p4426_p9 }
  0x43   : > { %693 = vmatprep.subr.bf16.mxu0 %v2808_v25  ;;  %886 = vmatprep.subr.bf16.mxu1 %v2811_v26  ;;  %v236_v33 = vld [vmem:[%s3092_s30 + $0x78] sm:$0xff]  ;;  %v2816_v35 = vld [vmem:[%s4345_s1 + $0xa0] ss:$20 sps:$4 sm:$0xff]   ;;  %v238_v39 = vld [vmem:[%s3092_s30 + $0x88] sm:$0xff]  ;;  %p2909_p4 = por %p2908_p3, %p2907_p2 }
  0x44   : > { %v2820_v37 = vld [vmem:[%s4345_s1 + $0xcc] ss:$20 sps:$4 sm:$0xff]   ;;  %v2823_v38 = vld [vmem:[%s4345_s1 + $0xd4] ss:$20 sps:$4 sm:$0xff]   ;;  %v2825_v42 = vld [vmem:[%s4345_s1 + $0xd0] ss:$20 sps:$4 sm:$0xff]   ;;  %p2903_p12 = pneg %p2902_p10 }
  0x45   : > { %271 = vperm.xlu1 %2789, %v226_v5   ;;  %268 = vperm.xlu0 %2788, %v225_v6   ;;  %v237_v40 = vld [vmem:[%s3092_s30 + $0x80] sm:$0xff]  ;;  %v2822_v41 = vld [vmem:[%s4345_s1 + $0xc8] ss:$20 sps:$4 sm:$0xff]   ;;  %v239_v45 = vld [vmem:[%s3092_s30 + $0x90] sm:$0xff]  ;;  %v3226_v5 = vand.u32 127, %v253_v3 }
  0x46   : > { %694 = vmatpush1.bf16.msra.mxu0 %v2810_v29  ;;  %887 = vmatpush1.bf16.msra.mxu1 %v2813_v30  ;;  %v2826_v43 = vld [vmem:[%s4345_s1 + $0xf4] ss:$20 sps:$4 sm:$0xff]   ;;  %v240_v44 = vld [vmem:[%s3092_s30 + $0x98] sm:$0xff]  ;;  %v2828_v47 = vld [vmem:[%s4345_s1 + $0xf0] ss:$20 sps:$4 sm:$0xff]   ;;  %p2910_p7 = pnand %p2909_p4, %p2903_p12 }
  0x47   : > { %695 = vmatprep.subr.bf16.mxu0 %v2814_v31  ;;  %888 = vmatprep.subr.bf16.mxu1 %v2817_v32  ;;  %v2829_v46 = vld [vmem:[%s4345_s1 + $0xfc] ss:$20 sps:$4 sm:$0xff]   ;;  %v2831_v48 = vld [vmem:[%s4345_s1 + $0xf8] ss:$20 sps:$4 sm:$0xff]   ;;  %v241_v52 = vld [vmem:[%s3092_s30 + $0xa0] sm:$0xff] }
  0x48   : > { %v2832_v49 = vld [vmem:[%s4345_s1 + $0x11c] ss:$20 sps:$4 sm:$0xff]   ;;  %v2835_v50 = vld [vmem:[%s4345_s1 + $0x124] ss:$20 sps:$4 sm:$0xff]   ;;  %v242_v51 = vld [vmem:[%s3092_s30 + $0xa8] sm:$0xff] }
  0x49   : > { %277 = vperm.xlu1 %2789, %v228_v7   ;;  %274 = vperm.xlu0 %2788, %v227_v8   ;;  %v2834_v53 = vld [vmem:[%s4345_s1 + $0x118] ss:$20 sps:$4 sm:$0xff]   ;;  %v2837_v54 = vld [vmem:[%s4345_s1 + $0x120] ss:$20 sps:$4 sm:$0xff]   ;;  %v2838_v55 = vld [vmem:[%s4345_s1 + $0x10] ss:$20 sps:$4 sm:$0xff]  }
  0x4a   : > { %696 = vmatpush1.bf16.msra.mxu0 %v2816_v35  ;;  %889 = vmatpush1.bf16.msra.mxu1 %v2819_v36  ;;  %v244_v56 = vld [vmem:[%s3092_s30 + $0xb8] sm:$0xff]  ;;  %v243_v57 = vld [vmem:[%s3092_s30 + $0xb0] sm:$0xff]  ;;  %v246_v58 = vld [vmem:[%s3092_s30 + $0xc8] sm:$0xff] }
  0x4b   : > { %697 = vmatprep.subr.bf16.mxu0 %v2820_v37  ;;  %890 = vmatprep.subr.bf16.mxu1 %v2823_v38  ;;  %v245_v59 = vld [vmem:[%s3092_s30 + $0xc0] sm:$0xff]  ;;  %v248_v60 = vld [vmem:[%s3092_s30 + $0xd8] sm:$0xff]  ;;  %v247_v61 = vld [vmem:[%s3092_s30 + $0xd0] sm:$0xff] }
  0x4c   : > { %v250_v62 = vld [vmem:[%s3092_s30 + $0xe8] sm:$0xff]  ;;  %v249_v63 = vld [vmem:[%s3092_s30 + $0xe0] sm:$0xff]  ;;  %v252_v1 = vld [vmem:[%s3092_s30 + $0xf8] sm:$0xff] }
  0x4d   : > { %283 = vperm.xlu1 %2789, %v230_v11   ;;  %280 = vperm.xlu0 %2788, %v229_v12   ;;  %v251_v2 = vld [vmem:[%s3092_s30 + $0xf0] sm:$0xff]  ;;  %v2839_v8 = vld [vmem:[%s4345_s1 + $0x38] ss:$20 sps:$4 sm:$0xff]   ;;  %v2841_v14 = vld [vmem:[%s4345_s1 + $0x88] ss:$20 sps:$4 sm:$0xff]   ;;  %s2349_s30 = scalar_lea.sflag [#allocation4], %s204_s23 }
  0x4e   : > { %698 = vmatpush1.bf16.msra.mxu0 %v2822_v41  ;;  %891 = vmatpush1.bf16.msra.mxu1 %v2825_v42  ;;  %v2840_v11 = vld [vmem:[%s4345_s1 + $0x60] ss:$20 sps:$4 sm:$0xff]   ;;  %v2842_v17 = vld [vmem:[%s4345_s1 + $0xb0] ss:$20 sps:$4 sm:$0xff]   ;;  %v2845_v24 = vld [vmem:[%s4345_s1 + $0x128] ss:$20 sps:$4 sm:$0xff]  }
  0x4f   : > { %699 = vmatprep.subr.bf16.mxu0 %v2826_v43  ;;  %892 = vmatprep.subr.bf16.mxu1 %v2829_v46  ;;  %v2844_v22 = vld [vmem:[%s4345_s1 + $0x100] ss:$20 sps:$4 sm:$0xff]  }
  0x50   : > { %v2851_v13 = vld [vmem:[%s4347_s3 + $0x10] sm:$0xff]  }
  0x51   : > { %289 = vperm.xlu1 %2789, %v232_v19   ;;  %286 = vperm.xlu0 %2788, %v231_v21   ;;  %v2843_v19 = vld [vmem:[%s4345_s1 + $0xd8] ss:$20 sps:$4 sm:$0xff]  }
  0x52   : > { %700 = vmatpush1.bf16.msra.mxu0 %v2828_v47  ;;  %893 = vmatpush1.bf16.msra.mxu1 %v2831_v48 }
  0x53   : > { %701 = vmatprep.subr.bf16.mxu0 %v2832_v49  ;;  %894 = vmatprep.subr.bf16.mxu1 %v2835_v50 }
  0x55   : > { %295 = vperm.xlu1 %2789, %v234_v27   ;;  %292 = vperm.xlu0 %2788, %v233_v28  }
  0x56   : > { %702 = vmatpush1.bf16.msra.mxu0 %v2834_v53  ;;  %895 = vmatpush1.bf16.msra.mxu1 %v2837_v54  ;;  %v4393_v54 = vmov 0 }
  0x57   : > { %2664 = vmatprep.subr.bf16.mxu0 %v2838_v55 }
  0x59   : > { %301 = vperm.xlu1 %2789, %v236_v33   ;;  %298 = vperm.xlu0 %2788, %v235_v34  }
  0x5d   : > { %307 = vperm.xlu1 %2789, %v238_v39   ;;  %304 = vperm.xlu0 %2788, %v237_v40  }
  0x61   : > { %313 = vperm.xlu1 %2789, %v240_v44   ;;  %310 = vperm.xlu0 %2788, %v239_v45  }
  0x65   : > { %319 = vperm.xlu1 %2789, %v242_v51   ;;  %316 = vperm.xlu0 %2788, %v241_v52   ;;  %v4391_v51 = vmov 0 }
  0x69   : > { %325 = vperm.xlu1 %2789, %v244_v56   ;;  %322 = vperm.xlu0 %2788, %v243_v57  }
  0x6d   : > { %331 = vperm.xlu1 %2789, %v246_v58   ;;  %328 = vperm.xlu0 %2788, %v245_v59  }
  0x71   : > { %337 = vperm.xlu1 %2789, %v248_v60   ;;  %334 = vperm.xlu0 %2788, %v247_v61   ;;  %v2847_v61 = vld [vmem:[%s4347_s3] sm:$0xff]  }
  0x75   : > { %343 = vperm.xlu1 %2789, %v250_v62   ;;  %340 = vperm.xlu0 %2788, %v249_v63   ;;  %v2848_v62 = vld [vmem:[%s4347_s3 + $0x48] sm:$0xff]  }
  0x76   : > { %v2849_v63 = vld [vmem:[%s4347_s3 + $0x8] sm:$0xff]  }
  0x79   : > { %349 = vperm.xlu1 %2789, %v252_v1   ;;  %346 = vperm.xlu0 %2788, %v251_v2   ;;  %v3532_v1 = vshrl.u32 %v253_v3, 7 }
  0xbc   : > { %v257_v4 = vpop.permute.xlu0 %256  ;;  %v263_v7 = vpop.permute.xlu1 %262 }
  0xbd   : > { %vm351_vm1 = vcmp.eq.s32.totalorder %v257_v4, %v3226_v5  ;;  %vm353_vm3 = vcmp.eq.s32.totalorder %v263_v7, %v3226_v5 }
  0xc0   : > { %v260_v6 = vpop.permute.xlu0 %259  ;;  %v266_v12 = vpop.permute.xlu1 %265 }
  0xc1   : > { %vm352_vm0 = vcmp.eq.s32.totalorder %v260_v6, %v3226_v5  ;;  %vm354_vm4 = vcmp.eq.s32.totalorder %v266_v12, %v3226_v5  ;;  %v2850_v12 = vld [vmem:[%s4347_s3 + $0x50] sm:$0xff]  }
  0xc2   : > { %vm3233_vm2 = vmpackc.low %vm352_vm0, %vm351_vm1 }
  0xc3   : > { %2483 = vmatmul.mubr.msk.bf16.vlgmr.msra.gmra.mrb[0].mxu0 %vm3233_vm2, %v2972_v10  ;;  %2515 = vmatmul.mubr.msk.bf16.vlgmr.msra.gmra.mrb[0].mxu1 %vm3233_vm2, %v2972_v10  ;;  %vm3250_vm5 = vmpackc.low %vm354_vm4, %vm353_vm3 }
  0xc4   : > { %2665 = vmatpush3.bf16.msra.mxu0 %v2838_v55  ;;  %729 = vmatprep.mubr.bf16.mxu0 %v2971_v0  ;;  %v272_v15 = vpop.permute.xlu1 %271  ;;  %v269_v16 = vpop.permute.xlu0 %268 }
  0xc5   : > { %922 = vmatprep.mubr.bf16.mxu1 %v2971_v0  ;;  %2666 = vmatprep.subr.bf16.mxu0 %v2839_v8  ;;  %vm356_vm6 = vcmp.eq.s32.totalorder %v272_v15, %v3226_v5  ;;  %vm355_vm7 = vcmp.eq.s32.totalorder %v269_v16, %v3226_v5 }
  0xc6   : > { %vm3270_vm8 = vmpackc.low %vm356_vm6, %vm355_vm7 }
  0xc8   : > { %2667 = vmatpush3.bf16.msra.mxu0 %v2839_v8  ;;  %v278_v20 = vpop.permute.xlu1 %277  ;;  %v275_v21 = vpop.permute.xlu0 %274 }
  0xc9   : > { %2668 = vmatprep.subr.bf16.mxu0 %v2840_v11  ;;  %vm358_vm9 = vcmp.eq.s32.totalorder %v278_v20, %v3226_v5  ;;  %vm357_vm10 = vcmp.eq.s32.totalorder %v275_v21, %v3226_v5 }
  0xca   : > { %vm3290_vm11 = vmpackc.low %vm358_vm9, %vm357_vm10 }
  0xcb   : > { %2485 = vmatmul.mubr.msk.bf16.gmra.mrb[4].mxu0 %vm3250_vm5, %v2972_v10  ;;  %2517 = vmatmul.mubr.msk.bf16.gmra.mrb[4].mxu1 %vm3250_vm5, %v2972_v10 }
  0xcc   : > { %739 = vmatprep.mubr.bf16.mxu0 %v2971_v0  ;;  %932 = vmatprep.mubr.bf16.mxu1 %v2971_v0  ;;  %v284_v25 = vpop.permute.xlu1 %283  ;;  %v281_v26 = vpop.permute.xlu0 %280 }
  0xcd   : > { %2669 = vmatpush3.bf16.msra.mxu0 %v2840_v11  ;;  %vm360_vm12 = vcmp.eq.s32.totalorder %v284_v25, %v3226_v5  ;;  %vm359_vm13 = vcmp.eq.s32.totalorder %v281_v26, %v3226_v5 }
  0xce   : > { %2670 = vmatprep.subr.bf16.mxu0 %v2841_v14  ;;  %vm3307_vm14 = vmpackc.low %vm360_vm12, %vm359_vm13 }
  0xd0   : > { %v290_v28 = vpop.permute.xlu1 %289  ;;  %v287_v29 = vpop.permute.xlu0 %286 }
  0xd1   : > { %2671 = vmatpush3.bf16.msra.mxu0 %v2841_v14  ;;  %vm362_vm15 = vcmp.eq.s32.totalorder %v290_v28, %v3226_v5  ;;  %vm361_vm0 = vcmp.eq.s32.totalorder %v287_v29, %v3226_v5 }
  0xd2   : > { %2672 = vmatprep.subr.bf16.mxu0 %v2842_v17  ;;  %vm3321_vm1 = vmpackc.low %vm362_vm15, %vm361_vm0 }
  0xd3   : > { %2487 = vmatmul.mubr.msk.bf16.gmra.mrb[8].mxu0 %vm3270_vm8, %v2972_v10  ;;  %2519 = vmatmul.mubr.msk.bf16.gmra.mrb[8].mxu1 %vm3270_vm8, %v2972_v10 }
  0xd4   : > { %749 = vmatprep.mubr.bf16.mxu0 %v2971_v0  ;;  %942 = vmatprep.mubr.bf16.mxu1 %v2971_v0  ;;  %v296_v31 = vpop.permute.xlu1 %295  ;;  %v293_v32 = vpop.permute.xlu0 %292 }
  0xd5   : > { %2673 = vmatpush3.bf16.msra.mxu0 %v2842_v17  ;;  %vm364_vm3 = vcmp.eq.s32.totalorder %v296_v31, %v3226_v5  ;;  %vm363_vm4 = vcmp.eq.s32.totalorder %v293_v32, %v3226_v5 }
  0xd6   : > { %2674 = vmatprep.subr.bf16.mxu0 %v2843_v19  ;;  %vm3335_vm6 = vmpackc.low %vm364_vm3, %vm363_vm4 }
  0xd8   : > { %v302_v34 = vpop.permute.xlu1 %301  ;;  %v299_v35 = vpop.permute.xlu0 %298 }
  0xd9   : > { %2675 = vmatpush3.bf16.msra.mxu0 %v2843_v19  ;;  %vm366_vm7 = vcmp.eq.s32.totalorder %v302_v34, %v3226_v5  ;;  %vm365_vm9 = vcmp.eq.s32.totalorder %v299_v35, %v3226_v5 }
  0xda   : > { %2676 = vmatprep.subr.bf16.mxu0 %v2844_v22  ;;  %vm3349_vm10 = vmpackc.low %vm366_vm7, %vm365_vm9 }
  0xdb   : > { %2489 = vmatmul.mubr.msk.bf16.gmra.mrb[12].mxu0 %vm3290_vm11, %v2972_v10  ;;  %2521 = vmatmul.mubr.msk.bf16.gmra.mrb[12].mxu1 %vm3290_vm11, %v2972_v10 }
  0xdc   : > { %759 = vmatprep.mubr.bf16.mxu0 %v2971_v0  ;;  %952 = vmatprep.mubr.bf16.mxu1 %v2971_v0  ;;  %v308_v37 = vpop.permute.xlu1 %307  ;;  %v305_v38 = vpop.permute.xlu0 %304 }
  0xdd   : > { %2677 = vmatpush3.bf16.msra.mxu0 %v2844_v22  ;;  %vm368_vm12 = vcmp.eq.s32.totalorder %v308_v37, %v3226_v5  ;;  %vm367_vm13 = vcmp.eq.s32.totalorder %v305_v38, %v3226_v5 }
  0xde   : > { %2678 = vmatprep.subr.bf16.mxu0 %v2845_v24  ;;  %vm3363_vm15 = vmpackc.low %vm368_vm12, %vm367_vm13 }
  0xe0   : > { %v314_v40 = vpop.permute.xlu1 %313  ;;  %v311_v41 = vpop.permute.xlu0 %310 }
  0xe1   : > { %2679 = vmatpush3.bf16.msra.mxu0 %v2845_v24  ;;  %vm370_vm0 = vcmp.eq.s32.totalorder %v314_v40, %v3226_v5  ;;  %vm369_vm3 = vcmp.eq.s32.totalorder %v311_v41, %v3226_v5 }
  0xe2   : > { %vm3377_vm4 = vmpackc.low %vm370_vm0, %vm369_vm3 }
  0xe3   : > { %2491 = vmatmul.mubr.msk.bf16.gmra.mrb[16].mxu0 %vm3307_vm14, %v2972_v10  ;;  %2523 = vmatmul.mubr.msk.bf16.gmra.mrb[16].mxu1 %vm3307_vm14, %v2972_v10 }
  0xe4   : > { %769 = vmatprep.mubr.bf16.mxu0 %v2971_v0  ;;  %962 = vmatprep.mubr.bf16.mxu1 %v2971_v0  ;;  %v320_v43 = vpop.permute.xlu1 %319  ;;  %v317_v44 = vpop.permute.xlu0 %316 }
  0xe5   : > { %vm372_vm7 = vcmp.eq.s32.totalorder %v320_v43, %v3226_v5  ;;  %vm371_vm9 = vcmp.eq.s32.totalorder %v317_v44, %v3226_v5 }
  0xe6   : > { %vm3391_vm12 = vmpackc.low %vm372_vm7, %vm371_vm9 }
  0xe8   : > { %v326_v46 = vpop.permute.xlu1 %325  ;;  %v323_v47 = vpop.permute.xlu0 %322 }
  0xe9   : > { %vm374_vm13 = vcmp.eq.s32.totalorder %v326_v46, %v3226_v5  ;;  %vm373_vm0 = vcmp.eq.s32.totalorder %v323_v47, %v3226_v5 }
  0xea   : > { %vm3405_vm3 = vmpackc.low %vm374_vm13, %vm373_vm0 }
  0xeb   : > { %2493 = vmatmul.mubr.msk.bf16.gmra.mrb[20].mxu0 %vm3321_vm1, %v2972_v10  ;;  %2525 = vmatmul.mubr.msk.bf16.gmra.mrb[20].mxu1 %vm3321_vm1, %v2972_v10 }
  0xec   : > { %779 = vmatprep.mubr.bf16.mxu0 %v2971_v0  ;;  %972 = vmatprep.mubr.bf16.mxu1 %v2971_v0  ;;  %v332_v49 = vpop.permute.xlu1 %331  ;;  %v329_v50 = vpop.permute.xlu0 %328 }
  0xed   : > { %vm376_vm7 = vcmp.eq.s32.totalorder %v332_v49, %v3226_v5  ;;  %vm375_vm9 = vcmp.eq.s32.totalorder %v329_v50, %v3226_v5 }
  0xee   : > { %vm3419_vm13 = vmpackc.low %vm376_vm7, %vm375_vm9 }
  0xef   : > { %v4392_v51 = vsel %vm3419_vm13, 4294967295, %v4391_v51 }
  0xf0   : > { %v338_v52 = vpop.permute.xlu1 %337  ;;  %v335_v53 = vpop.permute.xlu0 %334 }
  0xf1   : > { %vm378_vm0 = vcmp.eq.s32.totalorder %v338_v52, %v3226_v5  ;;  %vm377_vm7 = vcmp.eq.s32.totalorder %v335_v53, %v3226_v5 }
  0xf2   : > { %vm3433_vm9 = vmpackc.low %vm378_vm0, %vm377_vm7 }
  0xf3   : > { %2495 = vmatmul.mubr.msk.bf16.gmra.mrb[24].mxu0 %vm3335_vm6, %v2972_v10  ;;  %2527 = vmatmul.mubr.msk.bf16.gmra.mrb[24].mxu1 %vm3335_vm6, %v2972_v10  ;;  %v4394_v54 = vsel %vm3433_vm9, 4294967295, %v4393_v54 }
  0xf4   : > { %789 = vmatprep.mubr.bf16.mxu0 %v2971_v0  ;;  %982 = vmatprep.mubr.bf16.mxu1 %v2971_v0  ;;  %v344_v55 = vpop.permute.xlu1 %343  ;;  %v341_v56 = vpop.permute.xlu0 %340 }
  0xf5   : > { %vm379_vm0 = vcmp.eq.s32.totalorder %v341_v56, %v3226_v5 }
  0xf8   : > { %v350_v58 = vpop.permute.xlu1 %349  ;;  %v347_v59 = vpop.permute.xlu0 %346 }
  0xfb   : > { %2497 = vmatmul.mubr.msk.bf16.gmra.mrb[28].mxu0 %vm3349_vm10, %v2972_v10  ;;  %2529 = vmatmul.mubr.msk.bf16.gmra.mrb[28].mxu1 %vm3349_vm10, %v2972_v10 }
  0xfc   : > { %799 = vmatprep.mubr.bf16.mxu0 %v2971_v0  ;;  %992 = vmatprep.mubr.bf16.mxu1 %v2971_v0 }
 0x103   : > { %2499 = vmatmul.mubr.msk.bf16.gmra.mrb[32].mxu0 %vm3363_vm15, %v2972_v10  ;;  %2531 = vmatmul.mubr.msk.bf16.gmra.mrb[32].mxu1 %vm3363_vm15, %v2972_v10 }
 0x104   : > { %809 = vmatprep.mubr.bf16.mxu0 %v2971_v0  ;;  %1002 = vmatprep.mubr.bf16.mxu1 %v2971_v0 }
 0x10b   : > { %2501 = vmatmul.mubr.msk.bf16.gmra.mrb[36].mxu0 %vm3377_vm4, %v2972_v10  ;;  %2533 = vmatmul.mubr.msk.bf16.gmra.mrb[36].mxu1 %vm3377_vm4, %v2972_v10 }
 0x10c   : > { %819 = vmatprep.mubr.bf16.mxu0 %v2971_v0  ;;  %1012 = vmatprep.mubr.bf16.mxu1 %v2971_v0 }
 0x113   : > { %2503 = vmatmul.mubr.msk.bf16.gmra.mrb[40].mxu0 %vm3391_vm12, %v2972_v10  ;;  %2535 = vmatmul.mubr.msk.bf16.gmra.mrb[40].mxu1 %vm3391_vm12, %v2972_v10 }
 0x114   : > { %829 = vmatprep.mubr.bf16.mxu0 %v2971_v0  ;;  %1022 = vmatprep.mubr.bf16.mxu1 %v2971_v0 }
 0x11b   : > { %2505 = vmatmul.mubr.msk.bf16.gmra.mrb[44].mxu0 %vm3405_vm3, %v2972_v10  ;;  %2537 = vmatmul.mubr.msk.bf16.gmra.mrb[44].mxu1 %vm3405_vm3, %v2972_v10 }
 0x11c   : > { %839 = vmatprep.mubr.bf16.mxu0 %v2971_v0  ;;  %1032 = vmatprep.mubr.bf16.mxu1 %v2971_v0 }
 0x123   : > { %2507 = vmatmul.mubr.msk.bf16.gmra.mrb[48].mxu0 %vm3419_vm13, %v2972_v10  ;;  %2539 = vmatmul.mubr.msk.bf16.gmra.mrb[48].mxu1 %vm3419_vm13, %v2972_v10  ;;  %vm380_vm13 = vcmp.eq.s32.totalorder %v344_v55, %v3226_v5 }
 0x124   : > { %849 = vmatprep.mubr.bf16.mxu0 %v2971_v0  ;;  %1042 = vmatprep.mubr.bf16.mxu1 %v2971_v0  ;;  %vm3447_vm7 = vmpackc.low %vm380_vm13, %vm379_vm0  ;;  %vm381_vm13 = vcmp.eq.s32.totalorder %v347_v59, %v3226_v5 }
 0x12b   : > { %2509 = vmatmul.mubr.msk.bf16.gmra.mrb[52].mxu0 %vm3433_vm9, %v2972_v10  ;;  %2541 = vmatmul.mubr.msk.bf16.gmra.mrb[52].mxu1 %vm3433_vm9, %v2972_v10  ;;  %vm382_vm9 = vcmp.eq.s32.totalorder %v350_v58, %v3226_v5 }
 0x12c   : > { %859 = vmatprep.mubr.bf16.mxu0 %v2971_v0  ;;  %1052 = vmatprep.mubr.bf16.mxu1 %v2971_v0  ;;  %vm3461_vm0 = vmpackc.low %vm382_vm9, %vm381_vm13  ;;  %vm2040_vm9 = vcmask 1047559  }
 0x133   : > { %2511 = vmatmul.mubr.msk.bf16.gmra.mrb[56].mxu0 %vm3447_vm7, %v2972_v10  ;;  %2543 = vmatmul.mubr.msk.bf16.gmra.mrb[56].mxu1 %vm3447_vm7, %v2972_v10 }
 0x134   : > { %869 = vmatprep.mubr.bf16.mxu0 %v2971_v0  ;;  %1062 = vmatprep.mubr.bf16.mxu1 %v2971_v0  ;;  %v2846_v0 = vld [vmem:[%s4347_s3 + $0x40] sm:$0xff]  }
 0x135   : > { %2633 = vmatprep.subr.bf16.mxu1 %v2846_v0 }
 0x136   : > { %2634 = vmatpush3.bf16.msra.mxu1 %v2847_v61 }
 0x137   : > { %2635 = vmatprep.subr.bf16.mxu1 %v2848_v62 }
 0x13a   : > { %2636 = vmatpush3.bf16.msra.mxu1 %v2849_v63 }
 0x13b   : > { %2513 = vmatmul.mubr.msk.bf16.gmra.mrb[60].mxu0 %vm3461_vm0, %v2972_v10  ;;  %2545 = vmatmul.mubr.msk.bf16.gmra.mrb[60].mxu1 %vm3461_vm0, %v2972_v10 }
 0x13c   : > { %2680 = vmatprep.mubr.msk.bf16.mxu0 %vm3233_vm2, %v2972_v10  ;;  %vm4399_vm2 = vnez %v4392_v51  ;;  %2637 = vmatprep.subr.bf16.mxu1 %v2850_v12 }
 0x13e   : > { %2638 = vmatpush3.bf16.msra.mxu1 %v2851_v13 }
 0x143   : > { %2681 = vmatmul.mubr.msk.bf16.vlgmr.msra.gmra.mrb[64].mxu0 %vm3250_vm5, %v2972_v10  ;;  %vm4400_vm5 = vnez %v4394_v54 }
 0x144   : > { %2684 = vmatprep.mubr.msk.bf16.mxu0 %vm3270_vm8, %v2972_v10  ;;  %vm1365_vm8 = vcmp.lt.s32.totalorder %v3532_v1, 6 }
 0x14b   : > { %2685 = vmatmul.mubr.msk.bf16.gmra.mrb[68].mxu0 %vm3290_vm11, %v2972_v10  ;;  %vm1268_vm11 = vcmp.lt.s32.totalorder %v3532_v1, 7 }
 0x14c   : > { %2688 = vmatprep.mubr.msk.bf16.mxu0 %vm3307_vm14, %v2972_v10  ;;  %vm1462_vm14 = vcmp.lt.s32.totalorder %v3532_v1, 5 }
 0x153   : > { %2689 = vmatmul.mubr.msk.bf16.gmra.mrb[72].mxu0 %vm3321_vm1, %v2972_v10  ;;  %vm1559_vm1 = vcmp.lt.s32.totalorder %v3532_v1, 4 }
 0x154   : > { %2692 = vmatprep.mubr.msk.bf16.mxu0 %vm3335_vm6, %v2972_v10  ;;  %vm2028_vm6 = vcmask 1041409  }
 0x15b   : > { %2693 = vmatmul.mubr.msk.bf16.gmra.mrb[76].mxu0 %vm3349_vm10, %v2972_v10  ;;  %vm2030_vm10 = vcmask 1042434  }
 0x15c   : > { %2696 = vmatprep.mubr.msk.bf16.mxu0 %vm3363_vm15, %v2972_v10  ;;  %vm2032_vm15 = vcmask 1043459  }
 0x163   : > { %2697 = vmatmul.mubr.msk.bf16.gmra.mrb[80].mxu0 %vm3377_vm4, %v2972_v10  ;;  %vm2034_vm4 = vcmask 1044484  }
 0x164   : > { %2700 = vmatprep.mubr.msk.bf16.mxu0 %vm3391_vm12, %v2972_v10  ;;  %vm2036_vm12 = vcmask 1045509  }
 0x16b   : > { %2701 = vmatmul.mubr.msk.bf16.gmra.mrb[84].mxu0 %vm3405_vm3, %v2972_v10  ;;  %vm2038_vm3 = vcmask 1046534  }
 0x16c   : > { %2704 = vmatprep.mubr.msk.bf16.mxu0 %vm4399_vm2, %v2972_v10 }
 0x173   : > { %2705 = vmatmul.mubr.msk.bf16.gmra.mrb[88].mxu0 %vm4400_vm5, %v2972_v10 }
 0x174   : > { %2708 = vmatprep.mubr.msk.bf16.mxu0 %vm3447_vm7, %v2972_v10  ;;  %vm2974_vm7 = vmmov 0  }
 0x17b   : > { %2709 = vmatmul.mubr.msk.bf16.gmra.mrb[92].mxu0 %vm3461_vm0, %v2972_v10 }
 0x196   : > { %v721_v2 = vpop.f32.mrb[0].mxu0  ;;  %v3534_v4 = vpop.f32.mrb[0].mxu1 }
 0x197   : > { %v3536_v5 = vpop.f32.mrb[1].mxu0  ;;  %v3538_v6 = vpop.f32.mrb[1].mxu1  ;;  %v1333_v9 = vrot.slane %v3534_v4, 2 }
 0x198   : > { %v725_v7 = vpop.f32.mrb[2].mxu0  ;;  %v918_v8 = vpop.f32.mrb[2].mxu1  ;;  %v1234_v14 = vrot.slane %v3536_v5, 1  ;;  %v1430_v15 = vrot.slane %v3538_v6, 3 }
 0x199   : > { %v1334_v10 = vrot.slane %v918_v8, 2  ;;  %v727_v3 = vpop.f32.mrb[3].mxu0  ;;  %v920_v11 = vpop.f32.mrb[3].mxu1 }
 0x19a   : > { %v1235_v16 = vrot.slane %v727_v3, 1  ;;  %v1431_v17 = vrot.slane %v920_v11, 3 }
 0x19b   : > { %v1396_v18 = vsel %vm1365_vm8, %v1333_v9, %v1334_v10 }
 0x19c   : > { %v1299_v19 = vsel %vm1268_vm11, %v1234_v14, %v1235_v16  ;;  %v1493_v20 = vsel %vm1462_vm14, %v1430_v15, %v1431_v17 }
 0x19d   : > { %v1301_v21 = vadd.f32 %v1299_v19, %v721_v2 }
 0x19e   : > { %v731_v22 = vpop.f32.mrb[4].mxu0  ;;  %v924_v23 = vpop.f32.mrb[4].mxu1 }
 0x19f   : > { %v1398_v24 = vadd.f32 %v1396_v18, %v1301_v21  ;;  %v1335_v25 = vrot.slane %v924_v23, 2  ;;  %v733_v26 = vpop.f32.mrb[5].mxu0  ;;  %v926_v27 = vpop.f32.mrb[5].mxu1 }
 0x1a0   : > { %v1236_v28 = vrot.slane %v733_v26, 1  ;;  %v1432_v29 = vrot.slane %v926_v27, 3  ;;  %v735_v30 = vpop.f32.mrb[6].mxu0  ;;  %v928_v31 = vpop.f32.mrb[6].mxu1 }
 0x1a1   : > { %v3564_v32 = vadd.f32 %v1493_v20, %v1398_v24  ;;  %v1395_v33 = vsel %vm1365_vm8, %v1334_v10, %v1335_v25  ;;  %v1336_v34 = vrot.slane %v928_v31, 2  ;;  %v737_v35 = vpop.f32.mrb[7].mxu0  ;;  %v930_v36 = vpop.f32.mrb[7].mxu1 }
 0x1a2   : > { %v1298_v37 = vsel %vm1268_vm11, %v1235_v16, %v1236_v28  ;;  %v1492_v38 = vsel %vm1462_vm14, %v1431_v17, %v1432_v29  ;;  %v1237_v39 = vrot.slane %v737_v35, 1  ;;  %v1433_v40 = vrot.slane %v930_v36, 3 }
 0x1a3   : > { %v1302_v41 = vadd.f32 %v1298_v37, %v725_v7  ;;  %v1394_v42 = vsel %vm1365_vm8, %v1335_v25, %v1336_v34 }
 0x1a4   : > { %v1297_v43 = vsel %vm1268_vm11, %v1236_v28, %v1237_v39  ;;  %v1491_v44 = vsel %vm1462_vm14, %v1432_v29, %v1433_v40 }
 0x1a5   : > { %v1399_v45 = vadd.f32 %v1395_v33, %v1302_v41  ;;  %v1303_v46 = vadd.f32 %v1297_v43, %v731_v22 }
 0x1a6   : > { %v741_v47 = vpop.f32.mrb[8].mxu0  ;;  %v934_v48 = vpop.f32.mrb[8].mxu1 }
 0x1a7   : > { %v3578_v49 = vadd.f32 %v1492_v38, %v1399_v45  ;;  %v1400_v50 = vadd.f32 %v1394_v42, %v1303_v46  ;;  %v1337_v51 = vrot.slane %v934_v48, 2  ;;  %v743_v52 = vpop.f32.mrb[9].mxu0  ;;  %v936_v53 = vpop.f32.mrb[9].mxu1 }
 0x1a8   : > { %v1238_v54 = vrot.slane %v743_v52, 1  ;;  %v1434_v55 = vrot.slane %v936_v53, 3  ;;  %v745_v56 = vpop.f32.mrb[10].mxu0  ;;  %v938_v57 = vpop.f32.mrb[10].mxu1 }
 0x1a9   : > { %v3580_v58 = vadd.f32 %v1491_v44, %v1400_v50  ;;  %v1393_v59 = vsel %vm1365_vm8, %v1336_v34, %v1337_v51  ;;  %v1338_v60 = vrot.slane %v938_v57, 2  ;;  %v747_v0 = vpop.f32.mrb[11].mxu0  ;;  %v940_v61 = vpop.f32.mrb[11].mxu1 }
 0x1aa   : > { %v1296_v62 = vsel %vm1268_vm11, %v1237_v39, %v1238_v54  ;;  %v1490_v63 = vsel %vm1462_vm14, %v1433_v40, %v1434_v55  ;;  %v1239_v2 = vrot.slane %v747_v0, 1  ;;  %v1435_v7 = vrot.slane %v940_v61, 3 }
 0x1ab   : > { %v1304_v8 = vadd.f32 %v1296_v62, %v735_v30  ;;  %v1392_v10 = vsel %vm1365_vm8, %v1337_v51, %v1338_v60 }
 0x1ac   : > { %v1295_v3 = vsel %vm1268_vm11, %v1238_v54, %v1239_v2  ;;  %v1489_v11 = vsel %vm1462_vm14, %v1434_v55, %v1435_v7 }
 0x1ad   : > { %v1401_v12 = vadd.f32 %v1393_v59, %v1304_v8  ;;  %v1305_v13 = vadd.f32 %v1295_v3, %v741_v47 }
 0x1ae   : > { %v751_v16 = vpop.f32.mrb[12].mxu0  ;;  %v944_v17 = vpop.f32.mrb[12].mxu1 }
 0x1af   : > { %v3594_v18 = vadd.f32 %v1490_v63, %v1401_v12  ;;  %v1402_v19 = vadd.f32 %v1392_v10, %v1305_v13  ;;  %v1339_v20 = vrot.slane %v944_v17, 2  ;;  %v753_v21 = vpop.f32.mrb[13].mxu0  ;;  %v946_v22 = vpop.f32.mrb[13].mxu1  ;;  %v2852_v12 = vld [vmem:[%s4347_s3 + $0x58] sm:$0xff]  }
 0x1b0   : > { %v1240_v23 = vrot.slane %v753_v21, 1  ;;  %v1436_v24 = vrot.slane %v946_v22, 3  ;;  %v755_v25 = vpop.f32.mrb[14].mxu0  ;;  %v948_v26 = vpop.f32.mrb[14].mxu1  ;;  %v2853_v13 = vld [vmem:[%s4347_s3 + $0x18] sm:$0xff]   ;;  %2639 = vmatprep.subr.bf16.mxu1 %v2852_v12 }
 0x1b1   : > { %v3596_v27 = vadd.f32 %v1489_v11, %v1402_v19  ;;  %v1391_v28 = vsel %vm1365_vm8, %v1338_v60, %v1339_v20  ;;  %v1340_v29 = vrot.slane %v948_v26, 2  ;;  %v757_v30 = vpop.f32.mrb[15].mxu0  ;;  %v950_v31 = vpop.f32.mrb[15].mxu1  ;;  %2640 = vmatpush3.bf16.msra.mxu1 %v2853_v13 }
 0x1b2   : > { %v1294_v33 = vsel %vm1268_vm11, %v1239_v2, %v1240_v23  ;;  %v1488_v34 = vsel %vm1462_vm14, %v1435_v7, %v1436_v24  ;;  %v1241_v35 = vrot.slane %v757_v30, 1  ;;  %v1437_v36 = vrot.slane %v950_v31, 3 }
 0x1b3   : > { %v1306_v37 = vadd.f32 %v1294_v33, %v745_v56  ;;  %v1390_v38 = vsel %vm1365_vm8, %v1339_v20, %v1340_v29 }
 0x1b4   : > { %v1293_v39 = vsel %vm1268_vm11, %v1240_v23, %v1241_v35  ;;  %v1487_v40 = vsel %vm1462_vm14, %v1436_v24, %v1437_v36 }
 0x1b5   : > { %v1403_v41 = vadd.f32 %v1391_v28, %v1306_v37  ;;  %v1307_v42 = vadd.f32 %v1293_v39, %v751_v16 }
 0x1b6   : > { %v761_v43 = vpop.f32.mrb[16].mxu0  ;;  %v954_v44 = vpop.f32.mrb[16].mxu1 }
 0x1b7   : > { %v3610_v45 = vadd.f32 %v1488_v34, %v1403_v41  ;;  %v1404_v46 = vadd.f32 %v1390_v38, %v1307_v42  ;;  %v1341_v47 = vrot.slane %v954_v44, 2  ;;  %v763_v48 = vpop.f32.mrb[17].mxu0  ;;  %v956_v50 = vpop.f32.mrb[17].mxu1 }
 0x1b8   : > { %v1242_v51 = vrot.slane %v763_v48, 1  ;;  %v1438_v52 = vrot.slane %v956_v50, 3  ;;  %v765_v53 = vpop.f32.mrb[18].mxu0  ;;  %v958_v54 = vpop.f32.mrb[18].mxu1 }
 0x1b9   : > { %v3612_v55 = vadd.f32 %v1487_v40, %v1404_v46  ;;  %v1389_v56 = vsel %vm1365_vm8, %v1340_v29, %v1341_v47  ;;  %v1342_v57 = vrot.slane %v958_v54, 2  ;;  %v767_v59 = vpop.f32.mrb[19].mxu0  ;;  %v960_v60 = vpop.f32.mrb[19].mxu1 }
 0x1ba   : > { %v1292_v0 = vsel %vm1268_vm11, %v1241_v35, %v1242_v51  ;;  %v1486_v61 = vsel %vm1462_vm14, %v1437_v36, %v1438_v52  ;;  %v1243_v62 = vrot.slane %v767_v59, 1  ;;  %v1439_v63 = vrot.slane %v960_v60, 3 }
 0x1bb   : > { %v1308_v2 = vadd.f32 %v1292_v0, %v755_v25  ;;  %v1388_v7 = vsel %vm1365_vm8, %v1341_v47, %v1342_v57 }
 0x1bc   : > { %v1291_v8 = vsel %vm1268_vm11, %v1242_v51, %v1243_v62  ;;  %v1485_v10 = vsel %vm1462_vm14, %v1438_v52, %v1439_v63 }
 0x1bd   : > { %v1405_v3 = vadd.f32 %v1389_v56, %v1308_v2  ;;  %v1309_v11 = vadd.f32 %v1291_v8, %v761_v43 }
 0x1be   : > { %v771_v16 = vpop.f32.mrb[20].mxu0  ;;  %v964_v17 = vpop.f32.mrb[20].mxu1 }
 0x1bf   : > { %v3632_v19 = vadd.f32 %v1486_v61, %v1405_v3  ;;  %v1406_v20 = vadd.f32 %v1388_v7, %v1309_v11  ;;  %v1343_v21 = vrot.slane %v964_v17, 2  ;;  %v773_v22 = vpop.f32.mrb[21].mxu0  ;;  %v966_v23 = vpop.f32.mrb[21].mxu1 }
 0x1c0   : > { %v1244_v24 = vrot.slane %v773_v22, 1  ;;  %v1440_v25 = vrot.slane %v966_v23, 3  ;;  %v775_v26 = vpop.f32.mrb[22].mxu0  ;;  %v968_v28 = vpop.f32.mrb[22].mxu1 }
 0x1c1   : > { %v3634_v29 = vadd.f32 %v1485_v10, %v1406_v20  ;;  %v1387_v30 = vsel %vm1365_vm8, %v1342_v57, %v1343_v21  ;;  %v1344_v31 = vrot.slane %v968_v28, 2  ;;  %v777_v33 = vpop.f32.mrb[23].mxu0  ;;  %v970_v34 = vpop.f32.mrb[23].mxu1 }
 0x1c2   : > { %v1290_v35 = vsel %vm1268_vm11, %v1243_v62, %v1244_v24  ;;  %v1484_v36 = vsel %vm1462_vm14, %v1439_v63, %v1440_v25  ;;  %v1245_v37 = vrot.slane %v777_v33, 1  ;;  %v1441_v38 = vrot.slane %v970_v34, 3 }
 0x1c3   : > { %v1310_v39 = vadd.f32 %v1290_v35, %v765_v53  ;;  %v1386_v40 = vsel %vm1365_vm8, %v1343_v21, %v1344_v31 }
 0x1c4   : > { %v1289_v41 = vsel %vm1268_vm11, %v1244_v24, %v1245_v37  ;;  %v1483_v42 = vsel %vm1462_vm14, %v1440_v25, %v1441_v38 }
 0x1c5   : > { %v1407_v43 = vadd.f32 %v1387_v30, %v1310_v39  ;;  %v1311_v44 = vadd.f32 %v1289_v41, %v771_v16 }
 0x1c6   : > { %v781_v46 = vpop.f32.mrb[24].mxu0  ;;  %v974_v47 = vpop.f32.mrb[24].mxu1 }
 0x1c7   : > { %v3648_v48 = vadd.f32 %v1484_v36, %v1407_v43  ;;  %v1408_v50 = vadd.f32 %v1386_v40, %v1311_v44  ;;  %v1345_v51 = vrot.slane %v974_v47, 2  ;;  %v783_v52 = vpop.f32.mrb[25].mxu0  ;;  %v976_v54 = vpop.f32.mrb[25].mxu1 }
 0x1c8   : > { %v1246_v53 = vrot.slane %v783_v52, 1  ;;  %v1442_v56 = vrot.slane %v976_v54, 3  ;;  %v785_v57 = vpop.f32.mrb[26].mxu0  ;;  %v978_v59 = vpop.f32.mrb[26].mxu1 }
 0x1c9   : > { %v3650_v60 = vadd.f32 %v1483_v42, %v1408_v50  ;;  %v1385_v0 = vsel %vm1365_vm8, %v1344_v31, %v1345_v51  ;;  %v1346_v61 = vrot.slane %v978_v59, 2  ;;  %v787_v62 = vpop.f32.mrb[27].mxu0  ;;  %v980_v63 = vpop.f32.mrb[27].mxu1  ;;  %v2854_v50 = vld [vmem:[%s4347_s3 + $0x60] sm:$0xff]  }
 0x1ca   : > { %v1288_v2 = vsel %vm1268_vm11, %v1245_v37, %v1246_v53  ;;  %v1482_v7 = vsel %vm1462_vm14, %v1441_v38, %v1442_v56  ;;  %v1247_v8 = vrot.slane %v787_v62, 1  ;;  %v1443_v10 = vrot.slane %v980_v63, 3  ;;  %2641 = vmatprep.subr.bf16.mxu1 %v2854_v50 }
 0x1cb   : > { %v1312_v3 = vadd.f32 %v1288_v2, %v775_v26  ;;  %v1384_v11 = vsel %vm1365_vm8, %v1345_v51, %v1346_v61  ;;  %v2855_v51 = vld [vmem:[%s4347_s3 + $0x20] sm:$0xff]  }
 0x1cc   : > { %v1287_v12 = vsel %vm1268_vm11, %v1246_v53, %v1247_v8  ;;  %v1481_v13 = vsel %vm1462_vm14, %v1442_v56, %v1443_v10  ;;  %2642 = vmatpush3.bf16.msra.mxu1 %v2855_v51 }
 0x1cd   : > { %v1409_v16 = vadd.f32 %v1385_v0, %v1312_v3  ;;  %v1313_v17 = vadd.f32 %v1287_v12, %v781_v46 }
 0x1ce   : > { %v791_v20 = vpop.f32.mrb[28].mxu0  ;;  %v984_v21 = vpop.f32.mrb[28].mxu1 }
 0x1cf   : > { %v3664_v22 = vadd.f32 %v1482_v7, %v1409_v16  ;;  %v1410_v23 = vadd.f32 %v1384_v11, %v1313_v17  ;;  %v1347_v24 = vrot.slane %v984_v21, 2  ;;  %v793_v25 = vpop.f32.mrb[29].mxu0  ;;  %v986_v28 = vpop.f32.mrb[29].mxu1 }
 0x1d0   : > { %v1248_v26 = vrot.slane %v793_v25, 1  ;;  %v1444_v30 = vrot.slane %v986_v28, 3  ;;  %v795_v31 = vpop.f32.mrb[30].mxu0  ;;  %v988_v33 = vpop.f32.mrb[30].mxu1 }
 0x1d1   : > { %v3666_v34 = vadd.f32 %v1481_v13, %v1410_v23  ;;  %v1383_v35 = vsel %vm1365_vm8, %v1346_v61, %v1347_v24  ;;  %v1348_v36 = vrot.slane %v988_v33, 2  ;;  %v797_v37 = vpop.f32.mrb[31].mxu0  ;;  %v990_v38 = vpop.f32.mrb[31].mxu1 }
 0x1d2   : > { %v1286_v39 = vsel %vm1268_vm11, %v1247_v8, %v1248_v26  ;;  %v1480_v40 = vsel %vm1462_vm14, %v1443_v10, %v1444_v30  ;;  %v1249_v41 = vrot.slane %v797_v37, 1  ;;  %v1445_v42 = vrot.slane %v990_v38, 3 }
 0x1d3   : > { %v1314_v43 = vadd.f32 %v1286_v39, %v785_v57  ;;  %v1382_v44 = vsel %vm1365_vm8, %v1347_v24, %v1348_v36 }
 0x1d4   : > { %v1285_v46 = vsel %vm1268_vm11, %v1248_v26, %v1249_v41  ;;  %v1479_v47 = vsel %vm1462_vm14, %v1444_v30, %v1445_v42 }
 0x1d5   : > { %v1411_v52 = vadd.f32 %v1383_v35, %v1314_v43  ;;  %v1315_v54 = vadd.f32 %v1285_v46, %v791_v20 }
 0x1d6   : > { %v801_v53 = vpop.f32.mrb[32].mxu0  ;;  %v994_v56 = vpop.f32.mrb[32].mxu1 }
 0x1d7   : > { %v3686_v57 = vadd.f32 %v1480_v40, %v1411_v52  ;;  %v1412_v59 = vadd.f32 %v1382_v44, %v1315_v54  ;;  %v1349_v0 = vrot.slane %v994_v56, 2  ;;  %v803_v61 = vpop.f32.mrb[33].mxu0  ;;  %v996_v62 = vpop.f32.mrb[33].mxu1 }
 0x1d8   : > { %v1250_v63 = vrot.slane %v803_v61, 1  ;;  %v1446_v2 = vrot.slane %v996_v62, 3  ;;  %v805_v7 = vpop.f32.mrb[34].mxu0  ;;  %v998_v8 = vpop.f32.mrb[34].mxu1 }
 0x1d9   : > { %v3688_v10 = vadd.f32 %v1479_v47, %v1412_v59  ;;  %v1381_v3 = vsel %vm1365_vm8, %v1348_v36, %v1349_v0  ;;  %v1350_v11 = vrot.slane %v998_v8, 2  ;;  %v807_v12 = vpop.f32.mrb[35].mxu0  ;;  %v1000_v13 = vpop.f32.mrb[35].mxu1 }
 0x1da   : > { %v1284_v16 = vsel %vm1268_vm11, %v1249_v41, %v1250_v63  ;;  %v1478_v17 = vsel %vm1462_vm14, %v1445_v42, %v1446_v2  ;;  %v1251_v20 = vrot.slane %v807_v12, 1  ;;  %v1447_v21 = vrot.slane %v1000_v13, 3 }
 0x1db   : > { %v1316_v23 = vadd.f32 %v1284_v16, %v795_v31  ;;  %v1380_v24 = vsel %vm1365_vm8, %v1349_v0, %v1350_v11 }
 0x1dc   : > { %v1283_v25 = vsel %vm1268_vm11, %v1250_v63, %v1251_v20  ;;  %v1477_v28 = vsel %vm1462_vm14, %v1446_v2, %v1447_v21 }
 0x1dd   : > { %v1413_v26 = vadd.f32 %v1381_v3, %v1316_v23  ;;  %v1317_v30 = vadd.f32 %v1283_v25, %v801_v53 }
 0x1de   : > { %v811_v33 = vpop.f32.mrb[36].mxu0  ;;  %v1004_v35 = vpop.f32.mrb[36].mxu1 }
 0x1df   : > { %v3702_v36 = vadd.f32 %v1478_v17, %v1413_v26  ;;  %v1414_v37 = vadd.f32 %v1380_v24, %v1317_v30  ;;  %v1351_v38 = vrot.slane %v1004_v35, 2  ;;  %v813_v39 = vpop.f32.mrb[37].mxu0  ;;  %v1006_v40 = vpop.f32.mrb[37].mxu1 }
 0x1e0   : > { %v1252_v31 = vrot.slane %v813_v39, 1  ;;  %v1448_v41 = vrot.slane %v1006_v40, 3  ;;  %v815_v42 = vpop.f32.mrb[38].mxu0  ;;  %v1008_v43 = vpop.f32.mrb[38].mxu1 }
 0x1e1   : > { %v3704_v44 = vadd.f32 %v1477_v28, %v1414_v37  ;;  %v1379_v46 = vsel %vm1365_vm8, %v1350_v11, %v1351_v38  ;;  %v1352_v47 = vrot.slane %v1008_v43, 2  ;;  %v817_v50 = vpop.f32.mrb[39].mxu0  ;;  %v1010_v51 = vpop.f32.mrb[39].mxu1 }
 0x1e2   : > { %v1282_v52 = vsel %vm1268_vm11, %v1251_v20, %v1252_v31  ;;  %v1476_v54 = vsel %vm1462_vm14, %v1447_v21, %v1448_v41  ;;  %v1253_v53 = vrot.slane %v817_v50, 1  ;;  %v1449_v56 = vrot.slane %v1010_v51, 3 }
 0x1e3   : > { %v1318_v59 = vadd.f32 %v1282_v52, %v805_v7  ;;  %v1378_v0 = vsel %vm1365_vm8, %v1351_v38, %v1352_v47 }
 0x1e4   : > { %v1281_v61 = vsel %vm1268_vm11, %v1252_v31, %v1253_v53  ;;  %v1475_v62 = vsel %vm1462_vm14, %v1448_v41, %v1449_v56 }
 0x1e5   : > { %v1415_v63 = vadd.f32 %v1379_v46, %v1318_v59  ;;  %v1319_v2 = vadd.f32 %v1281_v61, %v811_v33 }
 0x1e6   : > { %v821_v8 = vpop.f32.mrb[40].mxu0  ;;  %v1014_v3 = vpop.f32.mrb[40].mxu1 }
 0x1e7   : > { %v3718_v11 = vadd.f32 %v1476_v54, %v1415_v63  ;;  %v1416_v12 = vadd.f32 %v1378_v0, %v1319_v2  ;;  %v1353_v13 = vrot.slane %v1014_v3, 2  ;;  %v823_v16 = vpop.f32.mrb[41].mxu0  ;;  %v1016_v17 = vpop.f32.mrb[41].mxu1 }
 0x1e8   : > { %v1254_v7 = vrot.slane %v823_v16, 1  ;;  %v1450_v20 = vrot.slane %v1016_v17, 3  ;;  %v825_v21 = vpop.f32.mrb[42].mxu0  ;;  %v1018_v23 = vpop.f32.mrb[42].mxu1 }
 0x1e9   : > { %v3720_v24 = vadd.f32 %v1475_v62, %v1416_v12  ;;  %v1377_v25 = vsel %vm1365_vm8, %v1352_v47, %v1353_v13  ;;  %v1354_v28 = vrot.slane %v1018_v23, 2  ;;  %v827_v26 = vpop.f32.mrb[43].mxu0  ;;  %v1020_v30 = vpop.f32.mrb[43].mxu1 }
 0x1ea   : > { %v1280_v33 = vsel %vm1268_vm11, %v1253_v53, %v1254_v7  ;;  %v1474_v35 = vsel %vm1462_vm14, %v1449_v56, %v1450_v20  ;;  %v1255_v37 = vrot.slane %v827_v26, 1  ;;  %v1451_v38 = vrot.slane %v1020_v30, 3 }
 0x1eb   : > { %v1320_v39 = vadd.f32 %v1280_v33, %v815_v42  ;;  %v1376_v40 = vsel %vm1365_vm8, %v1353_v13, %v1354_v28 }
 0x1ec   : > { %v1279_v31 = vsel %vm1268_vm11, %v1254_v7, %v1255_v37  ;;  %v1473_v41 = vsel %vm1462_vm14, %v1450_v20, %v1451_v38 }
 0x1ed   : > { %v1417_v43 = vadd.f32 %v1377_v25, %v1320_v39  ;;  %v1321_v46 = vadd.f32 %v1279_v31, %v821_v8 }
 0x1ee   : > { %v831_v47 = vpop.f32.mrb[44].mxu0  ;;  %v1024_v50 = vpop.f32.mrb[44].mxu1 }
 0x1ef   : > { %v3734_v51 = vadd.f32 %v1474_v35, %v1417_v43  ;;  %v1418_v52 = vadd.f32 %v1376_v40, %v1321_v46  ;;  %v1355_v54 = vrot.slane %v1024_v50, 2  ;;  %v833_v53 = vpop.f32.mrb[45].mxu0  ;;  %v1026_v56 = vpop.f32.mrb[45].mxu1  ;;  %v2856_v46 = vld [vmem:[%s4347_s3 + $0x68] sm:$0xff]  }
 0x1f0   : > { %v1256_v42 = vrot.slane %v833_v53, 1  ;;  %v1452_v59 = vrot.slane %v1026_v56, 3  ;;  %v835_v0 = vpop.f32.mrb[46].mxu0  ;;  %v1028_v61 = vpop.f32.mrb[46].mxu1  ;;  %2643 = vmatprep.subr.bf16.mxu1 %v2856_v46 }
 0x1f1   : > { %v3736_v62 = vadd.f32 %v1473_v41, %v1418_v52  ;;  %v1375_v63 = vsel %vm1365_vm8, %v1354_v28, %v1355_v54  ;;  %v1356_v2 = vrot.slane %v1028_v61, 2  ;;  %v837_v3 = vpop.f32.mrb[47].mxu0  ;;  %v1030_v8 = vpop.f32.mrb[47].mxu1 }
 0x1f2   : > { %v1278_v12 = vsel %vm1268_vm11, %v1255_v37, %v1256_v42  ;;  %v1472_v13 = vsel %vm1462_vm14, %v1451_v38, %v1452_v59  ;;  %v1257_v16 = vrot.slane %v837_v3, 1  ;;  %v1453_v17 = vrot.slane %v1030_v8, 3 }
 0x1f3   : > { %v1322_v7 = vadd.f32 %v1278_v12, %v825_v21  ;;  %v1374_v20 = vsel %vm1365_vm8, %v1355_v54, %v1356_v2 }
 0x1f4   : > { %v1277_v23 = vsel %vm1268_vm11, %v1256_v42, %v1257_v16  ;;  %v1471_v25 = vsel %vm1462_vm14, %v1452_v59, %v1453_v17 }
 0x1f5   : > { %v1419_v28 = vadd.f32 %v1375_v63, %v1322_v7  ;;  %v1323_v26 = vadd.f32 %v1277_v23, %v831_v47  ;;  %v2857_v47 = vld [vmem:[%s4347_s3 + $0x28] sm:$0xff]  }
 0x1f6   : > { %v841_v30 = vpop.f32.mrb[48].mxu0  ;;  %v1034_v33 = vpop.f32.mrb[48].mxu1  ;;  %2644 = vmatpush3.bf16.msra.mxu1 %v2857_v47 }
 0x1f7   : > { %v3750_v35 = vadd.f32 %v1472_v13, %v1419_v28  ;;  %v1420_v37 = vadd.f32 %v1374_v20, %v1323_v26  ;;  %v1357_v38 = vrot.slane %v1034_v33, 2  ;;  %v843_v39 = vpop.f32.mrb[49].mxu0  ;;  %v1036_v40 = vpop.f32.mrb[49].mxu1 }
 0x1f8   : > { %v1258_v21 = vrot.slane %v843_v39, 1  ;;  %v1454_v31 = vrot.slane %v1036_v40, 3  ;;  %v845_v41 = vpop.f32.mrb[50].mxu0  ;;  %v1038_v43 = vpop.f32.mrb[50].mxu1 }
 0x1f9   : > { %v3758_v50 = vadd.f32 %v1471_v25, %v1420_v37  ;;  %v1373_v52 = vsel %vm1365_vm8, %v1356_v2, %v1357_v38  ;;  %v1358_v54 = vrot.slane %v1038_v43, 2  ;;  %v847_v53 = vpop.f32.mrb[51].mxu0  ;;  %v1040_v56 = vpop.f32.mrb[51].mxu1 }
 0x1fa   : > { %v1276_v42 = vsel %vm1268_vm11, %v1257_v16, %v1258_v21  ;;  %v1470_v59 = vsel %vm1462_vm14, %v1453_v17, %v1454_v31  ;;  %v1259_v61 = vrot.slane %v847_v53, 1  ;;  %v1455_v63 = vrot.slane %v1040_v56, 3 }
 0x1fb   : > { %v1324_v3 = vadd.f32 %v1276_v42, %v835_v0  ;;  %v1372_v8 = vsel %vm1365_vm8, %v1357_v38, %v1358_v54 }
 0x1fc   : > { %v1275_v2 = vsel %vm1268_vm11, %v1258_v21, %v1259_v61  ;;  %v1469_v12 = vsel %vm1462_vm14, %v1454_v31, %v1455_v63 }
 0x1fd   : > { %v1421_v13 = vadd.f32 %v1373_v52, %v1324_v3  ;;  %v1325_v7 = vadd.f32 %v1275_v2, %v841_v30 }
 0x1fe   : > { %v851_v16 = vpop.f32.mrb[52].mxu0  ;;  %v1044_v20 = vpop.f32.mrb[52].mxu1 }
 0x1ff   : > { %v3772_v23 = vadd.f32 %v1470_v59, %v1421_v13  ;;  %v1422_v17 = vadd.f32 %v1372_v8, %v1325_v7  ;;  %v1359_v25 = vrot.slane %v1044_v20, 2  ;;  %v853_v28 = vpop.f32.mrb[53].mxu0  ;;  %v1046_v0 = vpop.f32.mrb[53].mxu1 }
 0x200   : > { %v1260_v26 = vrot.slane %v853_v28, 1  ;;  %v1456_v33 = vrot.slane %v1046_v0, 3  ;;  %v855_v37 = vpop.f32.mrb[54].mxu0  ;;  %v1048_v38 = vpop.f32.mrb[54].mxu1 }
 0x201   : > { %v3774_v39 = vadd.f32 %v1469_v12, %v1422_v17  ;;  %v1371_v40 = vsel %vm1365_vm8, %v1358_v54, %v1359_v25  ;;  %v1360_v21 = vrot.slane %v1048_v38, 2  ;;  %v857_v31 = vpop.f32.mrb[55].mxu0  ;;  %v1050_v30 = vpop.f32.mrb[55].mxu1 }
 0x202   : > { %v1274_v43 = vsel %vm1268_vm11, %v1259_v61, %v1260_v26  ;;  %v1468_v46 = vsel %vm1462_vm14, %v1455_v63, %v1456_v33  ;;  %v1261_v47 = vrot.slane %v857_v31, 1  ;;  %v1457_v52 = vrot.slane %v1050_v30, 3 }
 0x203   : > { %v1326_v53 = vadd.f32 %v1274_v43, %v845_v41  ;;  %v1370_v56 = vsel %vm1365_vm8, %v1359_v25, %v1360_v21 }
 0x204   : > { %v1273_v42 = vsel %vm1268_vm11, %v1260_v26, %v1261_v47  ;;  %v1467_v54 = vsel %vm1462_vm14, %v1456_v33, %v1457_v52 }
 0x205   : > { %v1423_v59 = vadd.f32 %v1371_v40, %v1326_v53  ;;  %v1327_v3 = vadd.f32 %v1273_v42, %v851_v16 }
 0x206   : > { %v861_v8 = vpop.f32.mrb[56].mxu0  ;;  %v1054_v2 = vpop.f32.mrb[56].mxu1 }
 0x207   : > { %v3788_v61 = vadd.f32 %v1468_v46, %v1423_v59  ;;  %v1424_v12 = vadd.f32 %v1370_v56, %v1327_v3  ;;  %v1361_v63 = vrot.slane %v1054_v2, 2  ;;  %v863_v13 = vpop.f32.mrb[57].mxu0  ;;  %v1056_v7 = vpop.f32.mrb[57].mxu1 }
 0x208   : > { %v1262_v41 = vrot.slane %v863_v13, 1  ;;  %v1458_v20 = vrot.slane %v1056_v7, 3  ;;  %v865_v17 = vpop.f32.mrb[58].mxu0  ;;  %v1058_v25 = vpop.f32.mrb[58].mxu1 }
 0x209   : > { %v3790_v28 = vadd.f32 %v1467_v54, %v1424_v12  ;;  %v1369_v0 = vsel %vm1365_vm8, %v1360_v21, %v1361_v63  ;;  %v1362_v26 = vrot.slane %v1058_v25, 2  ;;  %v867_v33 = vpop.f32.mrb[59].mxu0  ;;  %v1060_v16 = vpop.f32.mrb[59].mxu1 }
 0x20a   : > { %v1272_v38 = vsel %vm1268_vm11, %v1261_v47, %v1262_v41  ;;  %v1466_v40 = vsel %vm1462_vm14, %v1457_v52, %v1458_v20  ;;  %v1263_v31 = vrot.slane %v867_v33, 1  ;;  %v1459_v30 = vrot.slane %v1060_v16, 3 }
 0x20b   : > { %v1328_v43 = vadd.f32 %v1272_v38, %v855_v37  ;;  %v1368_v46 = vsel %vm1365_vm8, %v1361_v63, %v1362_v26  ;;  %v2860_v38 = vld [vmem:[%s4347_s3 + $0x78] sm:$0xff]  }
 0x20c   : > { %v1271_v53 = vsel %vm1268_vm11, %v1262_v41, %v1263_v31  ;;  %v1465_v21 = vsel %vm1462_vm14, %v1458_v20, %v1459_v30  ;;  %v2858_v41 = vld [vmem:[%s4347_s3 + $0x70] sm:$0xff]  }
 0x20d   : > { %v1425_v56 = vadd.f32 %v1369_v0, %v1328_v43  ;;  %v1329_v42 = vadd.f32 %v1271_v53, %v861_v8  ;;  %v2859_v8 = vld [vmem:[%s4347_s3 + $0x30] sm:$0xff]   ;;  %2645 = vmatprep.subr.bf16.mxu1 %v2858_v41 }
 0x20e   : > { %v871_v54 = vpop.f32.mrb[60].mxu0  ;;  %v1064_v59 = vpop.f32.mrb[60].mxu1  ;;  %2646 = vmatpush3.bf16.msra.mxu1 %v2859_v8  ;;  %v3854_v8 = vld [vmem:[#allocation2 + $0x20] ss:$0 sm:$0xff] }
 0x20f   : > { %v3804_v47 = vadd.f32 %v1466_v40, %v1425_v56  ;;  %v1426_v3 = vadd.f32 %v1368_v46, %v1329_v42  ;;  %v1363_v52 = vrot.slane %v1064_v59, 2  ;;  %v873_v2 = vpop.f32.mrb[61].mxu0  ;;  %v1066_v12 = vpop.f32.mrb[61].mxu1  ;;  %2647 = vmatprep.subr.bf16.mxu1 %v2860_v38 }
 0x210   : > { %v1264_v37 = vrot.slane %v873_v2, 1  ;;  %v1460_v13 = vrot.slane %v1066_v12, 3  ;;  %v875_v7 = vpop.f32.mrb[62].mxu0  ;;  %v1068_v63 = vpop.f32.mrb[62].mxu1 }
 0x211   : > { %4401 = vst [vmem:[#allocation8_spill] sm:$0xff] %v3804_v47  ;;  %v3812_v20 = vadd.f32 %v1465_v21, %v1426_v3  ;;  %v1367_v25 = vsel %vm1365_vm8, %v1362_v26, %v1363_v52  ;;  %v1364_v0 = vrot.slane %v1068_v63, 2  ;;  %v877_v33 = vpop.f32.mrb[63].mxu0  ;;  %v1070_v16 = vpop.f32.mrb[63].mxu1 }
 0x212   : > { %v1270_v40 = vsel %vm1268_vm11, %v1263_v31, %v1264_v37  ;;  %v1464_v43 = vsel %vm1462_vm14, %v1459_v30, %v1460_v13  ;;  %v1265_v46 = vrot.slane %v877_v33, 1  ;;  %v1461_v53 = vrot.slane %v1070_v16, 3  ;;  %v2861_v31 = vld [vmem:[%s4347_s3 + $0x38] sm:$0xff]  }
 0x213   : > { %4402 = vst [vmem:[#allocation9_spill] sm:$0xff] %v3812_v20  ;;  %v1330_v21 = vadd.f32 %v1270_v40, %v865_v17  ;;  %v1366_v26 = vsel %vm1365_vm8, %v1363_v52, %v1364_v0  ;;  %v1397_v56 = vsel %vm1365_vm8, %v1364_v0, %v1333_v9  ;;  %2648 = vmatpush3.bf16.msra.mxu1 %v2861_v31  ;;  %v3874_v31 = vld [vmem:[#allocation2 + $0x8] sm:$0xff] }
 0x214   : > { %v1269_v30 = vsel %vm1268_vm11, %v1264_v37, %v1265_v46  ;;  %v1300_v17 = vsel %vm1268_vm11, %v1265_v46, %v1234_v14  ;;  %v1463_v42 = vsel %vm1462_vm14, %v1460_v13, %v1461_v53  ;;  %v1494_v4 = vsel %vm1462_vm14, %v1461_v53, %v1430_v15  ;;  %v3868_v53 = vld [vmem:[#allocation2] sm:$0xff] }
 0x215   : > { %v1427_v9 = vadd.f32 %v1367_v25, %v1330_v21  ;;  %v1331_v59 = vadd.f32 %v1269_v30, %v871_v54  ;;  %v1332_v3 = vadd.f32 %v1300_v17, %v875_v7  ;;  %v3876_v30 = vld [vmem:[#allocation2 + $0x18] sm:$0xff] }
 0x216   : > { %v2682_v52 = vpop.f32.mrb[64].mxu0 }
 0x217   : > { %v3844_v2 = vadd.f32 %v1464_v43, %v1427_v9  ;;  %v1428_v12 = vadd.f32 %v1366_v26, %v1331_v59  ;;  %v1429_v5 = vadd.f32 %v1397_v56, %v1332_v3  ;;  %v3846_v37 = vpop.f32.mrb[65].mxu0  ;;  %v1529_v15 = vrot.slane %v2682_v52, 4  ;;  %v3872_v56 = vld [vmem:[#allocation2 + $0x10] sm:$0xff] }
 0x218   : > { %4404 = vst [vmem:[#allocation11_spill] sm:$0xff] %v3846_v37  ;;  %v2683_v14 = vpop.f32.mrb[66].mxu0  ;;  %v4356_v54 = vrot.slane %v3846_v37, 4 }
 0x219   : > { %4403 = vst [vmem:[#allocation10_spill] sm:$0xff] %v3844_v2  ;;  %v3849_v13 = vadd.f32 %v1463_v42, %v1428_v12  ;;  %v3851_v6 = vadd.f32 %v1494_v4, %v1429_v5  ;;  %v1530_v63 = vrot.slane %v2683_v14, 4  ;;  %v1110_v41 = vpop.f32.mrb[67].mxu0  ;;  %v4354_v5 = vmov 0.0  }
 0x21a   : > { %v1528_v7 = vrot.slane %v1110_v41, 4  ;;  %2712 = vmatprep.subr.bf16.mxu1 %v4354_v5 }
 0x21b   : > { %4405 = vst [vmem:[#allocation12_spill] sm:$0xff] %v3849_v13  ;;  %4406 = vst [vmem:[#allocation13_spill] sm:$0xff] %v3851_v6  ;;  %v1588_v25 = vsel %vm1559_vm1, %v1529_v15, %v1530_v63 }
 0x21c   : > { %v1594_v0 = vadd.f32 %v1588_v25, %v3580_v58  ;;  %v1589_v33 = vsel %vm1559_vm1, %v1528_v7, %v1529_v15  ;;  %v1590_v16 = vsel %vm1559_vm1, %v4356_v54, %v1528_v7 }
 0x21d   : > { %v1592_v38 = vadd.f32 %v1590_v16, %v3564_v32  ;;  %v1593_v40 = vadd.f32 %v1589_v33, %v3578_v49 }
 0x21e   : > { %v1630_v43 = vadd.f32 %v3854_v8, %v1594_v0  ;;  %v2686_v46 = vpop.f32.mrb[68].mxu0 }
 0x21f   : > { %v1628_v21 = vadd.f32 %v3854_v8, %v1592_v38  ;;  %v1629_v58 = vadd.f32 %v3854_v8, %v1593_v40  ;;  %v1123_v26 = vpop.f32.mrb[69].mxu0  ;;  %v1533_v3 = vrot.slane %v2686_v46, 4 }
 0x220   : > { %v1531_v17 = vrot.slane %v1123_v26, 4  ;;  %v2687_v32 = vpop.f32.mrb[70].mxu0  ;;  %v1662_v59 = vmax.f32 %v1630_v43, 0.0 }
 0x221   : > { %v1660_v42 = vmax.f32 %v1628_v21, 0.0  ;;  %v1661_v49 = vmax.f32 %v1629_v58, 0.0  ;;  %v1534_v4 = vrot.slane %v2687_v32, 4  ;;  %v1126_v9 = vpop.f32.mrb[71].mxu0 }
 0x222   : > { %v1587_v52 = vsel %vm1559_vm1, %v1530_v63, %v1531_v17  ;;  %v1532_v12 = vrot.slane %v1126_v9, 4  ;;  %v1694_v46 = vmul.f32 %v1662_v59, %v3868_v53  ;;  %v1838_v21 = vmul.f32 %v1662_v59, %v3872_v56 }
 0x223   : > { %v1692_v14 = vmul.f32 %v1660_v42, %v3868_v53  ;;  %v1693_v15 = vmul.f32 %v1661_v49, %v3874_v31  ;;  %v1836_v41 = vmul.f32 %v1660_v42, %v3872_v56  ;;  %v1837_v7 = vmul.f32 %v1661_v49, %v3876_v30 }
 0x224   : > { %v1595_v25 = vadd.f32 %v1587_v52, %v3594_v18  ;;  %v1584_v0 = vsel %vm1559_vm1, %v1533_v3, %v1534_v4  ;;  %v1585_v63 = vsel %vm1559_vm1, %v1532_v12, %v1533_v3  ;;  %v1586_v33 = vsel %vm1559_vm1, %v1531_v17, %v1532_v12 }
 0x225   : > { %v1724_v16 = vmax.f32 %v1692_v14, %v1693_v15  ;;  %v1868_v38 = vadd.f32 %v1837_v7, %v1836_v41  ;;  %v1598_v40 = vadd.f32 %v1584_v0, %v3612_v55  ;;  %v1596_v43 = vadd.f32 %v1586_v33, %v3596_v27 }
 0x226   : > { %v1631_v18 = vadd.f32 %v3854_v8, %v1595_v25  ;;  %v1597_v58 = vadd.f32 %v1585_v63, %v3610_v45  ;;  %v3898_v26 = vpop.f32.mrb[72].mxu0 }
 0x227   : > { %v1725_v32 = vrot.slane %v1724_v16, 4  ;;  %v1869_v42 = vrot.slane %v1868_v38, 4  ;;  %v1634_v17 = vadd.f32 %v3854_v8, %v1598_v40  ;;  %v1632_v49 = vadd.f32 %v3854_v8, %v1596_v43  ;;  %v3902_v9 = vpop.f32.mrb[73].mxu0 }
 0x228   : > { %v1663_v55 = vmax.f32 %v1631_v18, 0.0  ;;  %v1633_v27 = vadd.f32 %v3854_v8, %v1597_v58  ;;  %v1537_v3 = vrot.slane %v3898_v26, 4  ;;  %v4357_v59 = vrot.slane %v3902_v9, 4  ;;  %v3907_v52 = vpop.f32.mrb[74].mxu0 }
 0x229   : > { %v1726_v45 = vmax.f32 %v1724_v16, %v1725_v32  ;;  %v1870_v12 = vadd.f32 %v1869_v42, %v1868_v38  ;;  %v1666_v14 = vmax.f32 %v1634_v17, 0.0  ;;  %v1664_v15 = vmax.f32 %v1632_v49, 0.0  ;;  %v3909_v41 = vpop.f32.mrb[75].mxu0 }
 0x22a   : > { %v1695_v7 = vmul.f32 %v1663_v55, %v3874_v31  ;;  %v1839_v25 = vmul.f32 %v1663_v55, %v3876_v30  ;;  %v1665_v0 = vmax.f32 %v1633_v27, 0.0  ;;  %v1583_v63 = vsel %vm1559_vm1, %v1534_v4, %v4357_v59 }
 0x22b   : > { %v1727_v33 = vrot.slane %v1726_v45, 2  ;;  %v1871_v40 = vrot.slane %v1870_v12, 2  ;;  %v1698_v43 = vmul.f32 %v1666_v14, %v3868_v53  ;;  %v1842_v16 = vmul.f32 %v1666_v14, %v3872_v56 }
 0x22c   : > { %v1731_v38 = vmax.f32 %v1694_v46, %v1695_v7  ;;  %v1875_v18 = vadd.f32 %v1839_v25, %v1838_v21  ;;  %v1696_v58 = vmul.f32 %v1664_v15, %v3868_v53  ;;  %v1697_v26 = vmul.f32 %v1665_v0, %v3874_v31 }
 0x22d   : > { %v1728_v32 = vmax.f32 %v1726_v45, %v1727_v33  ;;  %v1872_v42 = vadd.f32 %v1871_v40, %v1870_v12  ;;  %v1840_v17 = vmul.f32 %v1664_v15, %v3872_v56  ;;  %v1841_v49 = vmul.f32 %v1665_v0, %v3876_v30 }
 0x22e   : > { %v1732_v55 = vrot.slane %v1731_v38, 4  ;;  %v1876_v4 = vrot.slane %v1875_v18, 4  ;;  %v1738_v27 = vmax.f32 %v1696_v58, %v1697_v26  ;;  %v1599_v5 = vadd.f32 %v1583_v63, %v3632_v19  ;;  %v3924_v54 = vpop.f32.mrb[76].mxu0 }
 0x22f   : > { %v1729_v14 = vrot.slane %v1728_v32, 1  ;;  %v1873_v46 = vrot.slane %v1872_v42, 1  ;;  %v1882_v21 = vadd.f32 %v1841_v49, %v1840_v17  ;;  %v4358_v7 = vrot.slane %v3907_v52, 4  ;;  %v3927_v25 = vpop.f32.mrb[77].mxu0 }
 0x230   : > { %v1733_v45 = vmax.f32 %v1731_v38, %v1732_v55  ;;  %v1877_v12 = vadd.f32 %v1876_v4, %v1875_v18  ;;  %v1739_v33 = vrot.slane %v1738_v27, 4  ;;  %v1635_v15 = vadd.f32 %v3854_v8, %v1599_v5  ;;  %v3930_v0 = vpop.f32.mrb[78].mxu0 }
 0x231   : > { %v1730_v40 = vmax.f32 %v1728_v32, %v1729_v14  ;;  %v1874_v58 = vadd.f32 %v1873_v46, %v1872_v42  ;;  %v1883_v26 = vrot.slane %v1882_v21, 4  ;;  %v1580_v19 = vsel %vm1559_vm1, %v1537_v3, %v4358_v7  ;;  %v3936_v63 = vpop.f32.mrb[79].mxu0 }
 0x232   : > { %v1734_v17 = vrot.slane %v1733_v45, 2  ;;  %v1878_v49 = vrot.slane %v1877_v12, 2  ;;  %v1740_v59 = vmax.f32 %v1738_v27, %v1739_v33  ;;  %v1667_v38 = vmax.f32 %v1635_v15, 0.0 }
 0x233   : > { %v3938_v18 = vadd.f32 %v1874_v58, %v1730_v40  ;;  %v1884_v55 = vadd.f32 %v1883_v26, %v1882_v21  ;;  %v1602_v5 = vadd.f32 %v1580_v19, %v3650_v60  ;;  %v1536_v32 = vrot.slane %v3909_v41, 4 }
 0x234   : > { %v1735_v42 = vmax.f32 %v1733_v45, %v1734_v17  ;;  %v1879_v4 = vadd.f32 %v1878_v49, %v1877_v12  ;;  %v1741_v14 = vrot.slane %v1740_v59, 2  ;;  %v1699_v46 = vmul.f32 %v1667_v38, %v3874_v31 }
 0x235   : > { %v1885_v2 = vrot.slane %v1884_v55, 2  ;;  %v1843_v7 = vmul.f32 %v1667_v38, %v3876_v30  ;;  %v1638_v20 = vadd.f32 %v3854_v8, %v1602_v5  ;;  %v1581_v27 = vsel %vm1559_vm1, %v1536_v32, %v1537_v3 }
 0x236   : > { %v1736_v33 = vrot.slane %v1735_v42, 1  ;;  %v1880_v15 = vrot.slane %v1879_v4, 1  ;;  %v1742_v21 = vmax.f32 %v1740_v59, %v1741_v14  ;;  %v1745_v40 = vmax.f32 %v1698_v43, %v1699_v46  ;;  %v3947_v60 = vpop.f32.mrb[80].mxu0 }
 0x237   : > { %v1886_v41 = vadd.f32 %v1885_v2, %v1884_v55  ;;  %v1889_v45 = vadd.f32 %v1843_v7, %v1842_v16  ;;  %v1670_v12 = vmax.f32 %v1638_v20, 0.0  ;;  %v4407_v58 = vrot.slane %v3902_v9, 4  ;;  %v3953_v19 = vpop.f32.mrb[81].mxu0 }
 0x238   : > { %v1737_v17 = vmax.f32 %v1735_v42, %v1736_v33  ;;  %v1881_v49 = vadd.f32 %v1880_v15, %v1879_v4  ;;  %v1743_v38 = vrot.slane %v1742_v21, 1  ;;  %v1746_v3 = vrot.slane %v1745_v40, 4  ;;  %v3955_v5 = vpop.f32.mrb[82].mxu0 }
 0x239   : > { %v1582_v26 = vsel %vm1559_vm1, %v4407_v58, %v1536_v32  ;;  %v1887_v59 = vrot.slane %v1886_v41, 1  ;;  %v1890_v43 = vrot.slane %v1889_v45, 4  ;;  %v1702_v14 = vmul.f32 %v1670_v12, %v3868_v53  ;;  %v3959_v20 = vpop.f32.mrb[83].mxu0 }
 0x23a   : > { %v1846_v2 = vmul.f32 %v1670_v12, %v3872_v56  ;;  %v3961_v9 = vadd.f32 %v1881_v49, %v1737_v17  ;;  %v1744_v16 = vmax.f32 %v1742_v21, %v1743_v38  ;;  %v1747_v7 = vmax.f32 %v1745_v40, %v1746_v3 }
 0x23b   : > { %v1600_v55 = vadd.f32 %v1582_v26, %v3634_v29  ;;  %v1888_v32 = vadd.f32 %v1887_v59, %v1886_v41  ;;  %v1891_v42 = vadd.f32 %v1890_v43, %v1889_v45  ;;  %v1601_v4 = vadd.f32 %v1581_v27, %v3648_v48 }
 0x23c   : > { %v1541_v46 = vrot.slane %v3924_v54, 4  ;;  %v1748_v33 = vrot.slane %v1747_v7, 2  ;;  %v1539_v58 = vrot.slane %v3927_v25, 4  ;;  %v1542_v12 = vrot.slane %v3930_v0, 4 }
 0x23d   : > { %v1636_v15 = vadd.f32 %v3854_v8, %v1600_v55  ;;  %v3969_v6 = vadd.f32 %v1888_v32, %v1744_v16  ;;  %v1892_v17 = vrot.slane %v1891_v42, 2  ;;  %v1637_v21 = vadd.f32 %v3854_v8, %v1601_v4 }
 0x23e   : > { %v1540_v29 = vrot.slane %v3936_v63, 4  ;;  %v1749_v40 = vmax.f32 %v1747_v7, %v1748_v33  ;;  %v4408_v48 = vrot.slane %v3907_v52, 4  ;;  %v1576_v25 = vsel %vm1559_vm1, %v1541_v46, %v1542_v12  ;;  %v3981_v27 = vpop.f32.mrb[84].mxu0 }
 0x23f   : > { %v1668_v41 = vmax.f32 %v1636_v15, 0.0  ;;  %v1893_v45 = vadd.f32 %v1892_v17, %v1891_v42  ;;  %v1669_v26 = vmax.f32 %v1637_v21, 0.0  ;;  %v1606_v63 = vadd.f32 %v1576_v25, %v3688_v10  ;;  %v3985_v38 = vpop.f32.mrb[85].mxu0 }
 0x240   : > { %v1579_v54 = vsel %vm1559_vm1, %v4408_v48, %v1539_v58  ;;  %v1750_v3 = vrot.slane %v1749_v40, 1  ;;  %v1577_v43 = vsel %vm1559_vm1, %v1540_v29, %v1541_v46  ;;  %v3991_v16 = vpop.f32.mrb[86].mxu0  ;;  %v1578_v33 = vsel %vm1559_vm1, %v1539_v58, %v1540_v29 }
 0x241   : > { %v1603_v49 = vadd.f32 %v1579_v54, %v3664_v22  ;;  %v1700_v52 = vmul.f32 %v1668_v41, %v3868_v53  ;;  %v1844_v59 = vmul.f32 %v1668_v41, %v3872_v56  ;;  %v1894_v7 = vrot.slane %v1893_v45, 1  ;;  %v3996_v10 = vpop.f32.mrb[87].mxu0 }
 0x242   : > { %v1701_v55 = vmul.f32 %v1669_v26, %v3874_v31  ;;  %v1845_v32 = vmul.f32 %v1669_v26, %v3876_v30  ;;  %v3998_v42 = vmax.f32 %v1749_v40, %v1750_v3  ;;  %v1642_v4 = vadd.f32 %v3854_v8, %v1606_v63 }
 0x243   : > { %v1639_v22 = vadd.f32 %v3854_v8, %v1603_v49  ;;  %v1605_v46 = vadd.f32 %v1577_v43, %v3686_v57  ;;  %v4004_v15 = vadd.f32 %v1894_v7, %v1893_v45  ;;  %v1604_v54 = vadd.f32 %v1578_v33, %v3666_v34 }
 0x244   : > { %4409 = vst [vmem:[#allocation14_spill] sm:$0xff] %v3998_v42  ;;  %v1752_v17 = vmax.f32 %v1700_v52, %v1701_v55  ;;  %v1896_v21 = vadd.f32 %v1845_v32, %v1844_v59  ;;  %v1674_v48 = vmax.f32 %v1642_v4, 0.0  ;;  %v1543_v33 = vrot.slane %v3953_v19, 4 }
 0x245   : > { %4410 = vst [vmem:[#allocation15_spill] sm:$0xff] %v4004_v15  ;;  %v1671_v41 = vmax.f32 %v1639_v22, 0.0  ;;  %v1641_v25 = vadd.f32 %v3854_v8, %v1605_v46  ;;  %v1640_v45 = vadd.f32 %v3854_v8, %v1604_v54  ;;  %v4411_v15 = vrot.slane %v3947_v60, 4 }
 0x246   : > { %v1753_v26 = vrot.slane %v1752_v17, 4  ;;  %v1897_v49 = vrot.slane %v1896_v21, 4  ;;  %v4012_v57 = vmul.f32 %v1674_v48, %v3868_v53  ;;  %v4015_v29 = vmul.f32 %v1674_v48, %v3872_v56  ;;  %v4018_v34 = vpop.f32.mrb[88].mxu0 }
 0x247   : > { %v1703_v63 = vmul.f32 %v1671_v41, %v3874_v31  ;;  %v1847_v58 = vmul.f32 %v1671_v41, %v3876_v30  ;;  %v1673_v3 = vmax.f32 %v1641_v25, 0.0  ;;  %v4020_v55 = vpop.f32.mrb[89].mxu0  ;;  %v1672_v32 = vmax.f32 %v1640_v45, 0.0 }
 0x248   : > { %v1754_v52 = vmax.f32 %v1752_v17, %v1753_v26  ;;  %v1898_v59 = vadd.f32 %v1897_v49, %v1896_v21  ;;  %v4025_v46 = vpop.f32.mrb[90].mxu0  ;;  %v1575_v17 = vsel %vm1559_vm1, %v1542_v12, %v1543_v33  ;;  %v1546_v21 = vrot.slane %v3955_v5, 4 }
 0x249   : > { %v1759_v43 = vmax.f32 %v1702_v14, %v1703_v63  ;;  %v1903_v7 = vadd.f32 %v1847_v58, %v1846_v2  ;;  %v1705_v22 = vmul.f32 %v1673_v3, %v3874_v31  ;;  %v1849_v4 = vmul.f32 %v1673_v3, %v3876_v30  ;;  %v4027_v40 = vpop.f32.mrb[91].mxu0 }
 0x24a   : > { %v1755_v41 = vrot.slane %v1754_v52, 2  ;;  %v1899_v48 = vrot.slane %v1898_v59, 2  ;;  %v1704_v14 = vmul.f32 %v1672_v32, %v3868_v53  ;;  %v1848_v2 = vmul.f32 %v1672_v32, %v3872_v56 }
 0x24b   : > { %v1760_v54 = vrot.slane %v1759_v43, 4  ;;  %v1904_v25 = vrot.slane %v1903_v7, 4  ;;  %v1607_v3 = vadd.f32 %v1575_v17, %v3702_v36  ;;  %v1572_v32 = vsel %vm1559_vm1, %v4411_v15, %v1546_v21 }
 0x24c   : > { %v1756_v19 = vmax.f32 %v1754_v52, %v1755_v41  ;;  %v1900_v26 = vadd.f32 %v1899_v48, %v1898_v59  ;;  %v1766_v58 = vmax.f32 %v1704_v14, %v1705_v22  ;;  %v1910_v45 = vadd.f32 %v1849_v4, %v1848_v2 }
 0x24d   : > { %v1761_v49 = vmax.f32 %v1759_v43, %v1760_v54  ;;  %v1905_v63 = vadd.f32 %v1904_v25, %v1903_v7  ;;  %v1643_v5 = vadd.f32 %v3854_v8, %v1607_v3  ;;  %v1610_v52 = vadd.f32 %v1572_v32, %v3720_v24 }
 0x24e   : > { %v1757_v42 = vrot.slane %v1756_v19, 1  ;;  %v1901_v0 = vrot.slane %v1900_v26, 1  ;;  %v1767_v12 = vrot.slane %v1766_v58, 4  ;;  %v1911_v47 = vrot.slane %v1910_v45, 4  ;;  %v4043_v59 = vpop.f32.mrb[92].mxu0 }
 0x24f   : > { %v1762_v13 = vrot.slane %v1761_v49, 2  ;;  %v1906_v37 = vrot.slane %v1905_v63, 2  ;;  %v4053_v15 = vpop.f32.mrb[93].mxu0  ;;  %v1675_v48 = vmax.f32 %v1643_v5, 0.0  ;;  %v1646_v54 = vadd.f32 %v3854_v8, %v1610_v52 }
 0x250   : > { %v4045_v43 = vmax.f32 %v1756_v19, %v1757_v42  ;;  %v4047_v36 = vadd.f32 %v1901_v0, %v1900_v26  ;;  %v1768_v4 = vmax.f32 %v1766_v58, %v1767_v12  ;;  %v1912_v41 = vadd.f32 %v1911_v47, %v1910_v45  ;;  %v4056_v25 = vpop.f32.mrb[94].mxu0 }
 0x251   : > { %v4049_v7 = vmax.f32 %v1761_v49, %v1762_v13  ;;  %v4051_v22 = vadd.f32 %v1906_v37, %v1905_v63  ;;  %v1544_v14 = vrot.slane %v3959_v20, 4  ;;  %v1549_v13 = vrot.slane %v3981_v27, 4  ;;  %v4062_v2 = vpop.f32.mrb[95].mxu0 }
 0x252   : > { %v1769_v37 = vrot.slane %v1768_v4, 2  ;;  %v1913_v17 = vrot.slane %v1912_v41, 2  ;;  %v1707_v19 = vmul.f32 %v1675_v48, %v3874_v31  ;;  %v1851_v47 = vmul.f32 %v1675_v48, %v3876_v30 }
 0x253   : > { %v1764_v24 = vrot.slane %v4049_v7, 1  ;;  %v1678_v26 = vmax.f32 %v1646_v54, 0.0  ;;  %v4412_v49 = vrot.slane %v3947_v60, 4  ;;  %v1574_v58 = vsel %vm1559_vm1, %v1543_v33, %v1544_v14 }
 0x254   : > { %v1547_v20 = vrot.slane %v3985_v38, 4  ;;  %v4073_v27 = vmax.f32 %v1768_v4, %v1769_v37  ;;  %v4075_v45 = vadd.f32 %v1913_v17, %v1912_v41  ;;  %v1773_v3 = vmax.f32 %v4012_v57, %v1707_v19 }
 0x255   : > { %v1573_v63 = vsel %vm1559_vm1, %v1544_v14, %v4412_v49  ;;  %v1917_v32 = vadd.f32 %v1851_v47, %v4015_v29  ;;  %v1710_v0 = vmul.f32 %v1678_v26, %v3868_v53  ;;  %v1854_v60 = vmul.f32 %v1678_v26, %v3872_v56 }
 0x256   : > { %v1608_v12 = vadd.f32 %v1574_v58, %v3704_v44  ;;  %v1609_v5 = vadd.f32 %v1573_v63, %v3718_v11  ;;  %v1774_v52 = vrot.slane %v1773_v3, 4  ;;  %v1571_v38 = vsel %vm1559_vm1, %v1546_v21, %v1547_v20 }
 0x257   : > { %v1918_v33 = vrot.slane %v1917_v32, 4  ;;  %v1550_v4 = vrot.slane %v3991_v16, 4  ;;  %v1611_v29 = vadd.f32 %v1571_v38, %v3734_v51  ;;  %v1548_v48 = vrot.slane %v3996_v10, 4 }
 0x258   : > { %v1644_v41 = vadd.f32 %v3854_v8, %v1608_v12  ;;  %v1645_v57 = vadd.f32 %v3854_v8, %v1609_v5  ;;  %v4090_v54 = vmax.f32 %v1773_v3, %v1774_v52  ;;  %v1553_v14 = vrot.slane %v4018_v34, 4 }
 0x259   : > { %v4092_v44 = vadd.f32 %v1918_v33, %v1917_v32  ;;  %v1568_v11 = vsel %vm1559_vm1, %v1549_v13, %v1550_v4  ;;  %v1647_v16 = vadd.f32 %v3854_v8, %v1611_v29  ;;  %v1569_v10 = vsel %vm1559_vm1, %v1548_v48, %v1549_v13 }
 0x25a   : > { %v1676_v21 = vmax.f32 %v1644_v41, 0.0  ;;  %v1677_v37 = vmax.f32 %v1645_v57, 0.0  ;;  %v1614_v17 = vadd.f32 %v1568_v11, %v3758_v50  ;;  %v1570_v47 = vsel %vm1559_vm1, %v1547_v20, %v1548_v48 }
 0x25b   : > { %v1679_v3 = vmax.f32 %v1647_v16, 0.0  ;;  %v1612_v32 = vadd.f32 %v1570_v47, %v3736_v62  ;;  %v1613_v12 = vadd.f32 %v1569_v10, %v3750_v35  ;;  %v1551_v52 = vrot.slane %v4020_v55, 4 }
 0x25c   : > { %v1708_v26 = vmul.f32 %v1676_v21, %v3868_v53  ;;  %v1709_v49 = vmul.f32 %v1677_v37, %v3874_v31  ;;  %v1852_v63 = vmul.f32 %v1676_v21, %v3872_v56  ;;  %v1853_v58 = vmul.f32 %v1677_v37, %v3876_v30 }
 0x25d   : > { %v1650_v50 = vadd.f32 %v3854_v8, %v1614_v17  ;;  %v1554_v20 = vrot.slane %v4025_v46, 4  ;;  %v1711_v33 = vmul.f32 %v1679_v3, %v3874_v31  ;;  %v1855_v38 = vmul.f32 %v1679_v3, %v3876_v30 }
 0x25e   : > { %v1780_v5 = vmax.f32 %v1708_v26, %v1709_v49  ;;  %v1924_v13 = vadd.f32 %v1853_v58, %v1852_v63  ;;  %v1648_v57 = vadd.f32 %v3854_v8, %v1612_v32  ;;  %v1649_v11 = vadd.f32 %v3854_v8, %v1613_v12 }
 0x25f   : > { %v1682_v41 = vmax.f32 %v1650_v50, 0.0  ;;  %v1567_v62 = vsel %vm1559_vm1, %v1550_v4, %v1551_v52  ;;  %v1787_v35 = vmax.f32 %v1710_v0, %v1711_v33  ;;  %v1931_v21 = vadd.f32 %v1855_v38, %v1854_v60 }
 0x260   : > { %v1781_v29 = vrot.slane %v1780_v5, 4  ;;  %v1925_v48 = vrot.slane %v1924_v13, 4  ;;  %v1680_v47 = vmax.f32 %v1648_v57, 0.0  ;;  %v1681_v26 = vmax.f32 %v1649_v11, 0.0 }
 0x261   : > { %v1714_v37 = vmul.f32 %v1682_v41, %v3868_v53  ;;  %v1858_v16 = vmul.f32 %v1682_v41, %v3872_v56  ;;  %v1788_v49 = vrot.slane %v1787_v35, 4  ;;  %v1932_v63 = vrot.slane %v1931_v21, 4 }
 0x262   : > { %v1782_v17 = vmax.f32 %v1780_v5, %v1781_v29  ;;  %v1926_v10 = vadd.f32 %v1925_v48, %v1924_v13  ;;  %v1615_v58 = vadd.f32 %v1567_v62, %v3772_v23  ;;  %v1564_v0 = vsel %vm1559_vm1, %v1553_v14, %v1554_v20 }
 0x263   : > { %v1712_v3 = vmul.f32 %v1680_v47, %v3868_v53  ;;  %v1713_v50 = vmul.f32 %v1681_v26, %v3874_v31  ;;  %v1789_v32 = vmax.f32 %v1787_v35, %v1788_v49  ;;  %v1933_v12 = vadd.f32 %v1932_v63, %v1931_v21 }
 0x264   : > { %v1783_v60 = vrot.slane %v1782_v17, 2  ;;  %v1927_v4 = vrot.slane %v1926_v10, 2  ;;  %v1856_v5 = vmul.f32 %v1680_v47, %v3872_v56  ;;  %v1857_v13 = vmul.f32 %v1681_v26, %v3876_v30 }
 0x265   : > { %v1794_v38 = vmax.f32 %v1712_v3, %v1713_v50  ;;  %v1651_v41 = vadd.f32 %v3854_v8, %v1615_v58  ;;  %v1790_v57 = vrot.slane %v1789_v32, 2  ;;  %v1934_v29 = vrot.slane %v1933_v12, 2 }
 0x266   : > { %v1784_v23 = vmax.f32 %v1782_v17, %v1783_v60  ;;  %v1928_v33 = vadd.f32 %v1927_v4, %v1926_v10  ;;  %v1938_v48 = vadd.f32 %v1857_v13, %v1856_v5  ;;  %v1618_v11 = vadd.f32 %v1564_v0, %v3790_v28 }
 0x267   : > { %v1795_v42 = vrot.slane %v1794_v38, 4  ;;  %v1683_v19 = vmax.f32 %v1651_v41, 0.0  ;;  %v1791_v35 = vmax.f32 %v1789_v32, %v1790_v57  ;;  %v1935_v21 = vadd.f32 %v1934_v29, %v1933_v12 }
 0x268   : > { %v1785_v62 = vrot.slane %v1784_v23, 1  ;;  %v1929_v51 = vrot.slane %v1928_v33, 1  ;;  %v1939_v49 = vrot.slane %v1938_v48, 4  ;;  %v1654_v47 = vadd.f32 %v3854_v8, %v1618_v11 }
 0x269   : > { %v1796_v10 = vmax.f32 %v1794_v38, %v1795_v42  ;;  %v1715_v63 = vmul.f32 %v1683_v19, %v3874_v31  ;;  %v1792_v58 = vrot.slane %v1791_v35, 1  ;;  %v1936_v60 = vrot.slane %v1935_v21, 1 }
 0x26a   : > { %v1786_v26 = vmax.f32 %v1784_v23, %v1785_v62  ;;  %v1930_v17 = vadd.f32 %v1929_v51, %v1928_v33  ;;  %v1940_v4 = vadd.f32 %v1939_v49, %v1938_v48  ;;  %v1859_v3 = vmul.f32 %v1683_v19, %v3876_v30 }
 0x26b   : > { %v1797_v0 = vrot.slane %v1796_v10, 2  ;;  %v1801_v50 = vmax.f32 %v1714_v37, %v1715_v63  ;;  %v1686_v5 = vmax.f32 %v1654_v47, 0.0  ;;  %v1793_v32 = vmax.f32 %v1791_v35, %v1792_v58 }
 0x26c   : > { %v4140_v28 = vadd.f32 %v1930_v17, %v1786_v26  ;;  %v1937_v12 = vadd.f32 %v1936_v60, %v1935_v21  ;;  %v1941_v13 = vrot.slane %v1940_v4, 2  ;;  %v1945_v41 = vadd.f32 %v1859_v3, %v1858_v16 }
 0x26d   : > { %v1798_v42 = vmax.f32 %v1796_v10, %v1797_v0  ;;  %v1802_v23 = vrot.slane %v1801_v50, 4  ;;  %v4145_v33 = vmul.f32 %v1686_v5, %v3868_v53  ;;  %v4150_v29 = vmul.f32 %v1686_v5, %v3872_v56 }
 0x26e   : > { %v1996_v51 = vsub.f32 %v3938_v18, %v4140_v28  ;;  %v4147_v38 = vadd.f32 %v1937_v12, %v1793_v32  ;;  %v1942_v19 = vadd.f32 %v1941_v13, %v1940_v4  ;;  %v1946_v57 = vrot.slane %v1945_v41, 4  ;;  %v4413_v12 = vld [vmem:[#allocation8_spill] sm:$0xff] }
 0x26f   : > { %v1799_v48 = vrot.slane %v1798_v42, 1  ;;  %v1803_v11 = vmax.f32 %v1801_v50, %v1802_v23  ;;  %v1552_v16 = vrot.slane %v4027_v40, 4  ;;  %v1557_v49 = vrot.slane %v4043_v59, 4  ;;  %v4416_v23 = vld [vmem:[#allocation12_spill] sm:$0xff] }
 0x270   : > { %v4152_v37 = vand.u32 2147483647, %v1996_v51  ;;  %v1997_v62 = vsub.f32 %v3961_v9, %v4147_v38  ;;  %v1943_v35 = vrot.slane %v1942_v19, 1  ;;  %v1947_v21 = vadd.f32 %v1946_v57, %v1945_v41  ;;  %v4414_v51 = vld [vmem:[#allocation11_spill] sm:$0xff] }
 0x271   : > { %v1800_v47 = vmax.f32 %v1798_v42, %v1799_v48  ;;  %v1804_v26 = vrot.slane %v1803_v11, 2  ;;  %v1565_v17 = vsel %vm1559_vm1, %v1552_v16, %v1553_v14  ;;  %v1566_v10 = vsel %vm1559_vm1, %v1551_v52, %v1552_v16 }
 0x272   : > { %v4166_v40 = vand.u32 2147483647, %v1997_v62  ;;  %v1944_v63 = vadd.f32 %v1943_v35, %v1942_v19  ;;  %v1948_v58 = vrot.slane %v1947_v21, 2  ;;  %v1616_v60 = vadd.f32 %v1566_v10, %v3774_v39 }
 0x273   : > { %v1805_v4 = vmax.f32 %v1803_v11, %v1804_v26  ;;  %v1617_v59 = vadd.f32 %v1565_v17, %v3788_v61  ;;  %v1555_v3 = vrot.slane %v4053_v15, 4  ;;  %v1558_v34 = vrot.slane %v4056_v25, 4 }
 0x274   : > { %v4172_v0 = vadd.f32 %v1944_v63, %v1800_v47  ;;  %v1949_v14 = vadd.f32 %v1948_v58, %v1947_v21  ;;  %v1652_v55 = vadd.f32 %v3854_v8, %v1616_v60  ;;  %v1556_v52 = vrot.slane %v4062_v2, 4  ;;  %v4417_v21 = vld [vmem:[#allocation13_spill] sm:$0xff] }
 0x275   : > { %v1806_v50 = vrot.slane %v1805_v4, 1  ;;  %v1653_v5 = vadd.f32 %v3854_v8, %v1617_v59  ;;  %v1563_v39 = vsel %vm1559_vm1, %v1554_v20, %v1555_v3  ;;  %v1560_v61 = vsel %vm1559_vm1, %v1557_v49, %v1558_v34 }
 0x276   : > { %v1998_v15 = vsub.f32 %v3969_v6, %v4172_v0  ;;  %v1950_v25 = vrot.slane %v1949_v14, 1  ;;  %v1684_v32 = vmax.f32 %v1652_v55, 0.0  ;;  %v1619_v13 = vadd.f32 %v1563_v39, %v4413_v12 }
 0x277   : > { %v4186_v41 = vmax.f32 %v1805_v4, %v1806_v50  ;;  %v1685_v2 = vmax.f32 %v1653_v5, 0.0  ;;  %v4415_v42 = vrot.slane %v4414_v51, 4  ;;  %v1622_v20 = vadd.f32 %v1560_v61, %v4416_v23  ;;  %v4419_v50 = vld [vmem:[#allocation10_spill] sm:$0xff] }
 0x278   : > { %v4193_v19 = vand.u32 2147483647, %v1998_v15  ;;  %v4195_v57 = vadd.f32 %v1950_v25, %v1949_v14  ;;  %v1716_v48 = vmul.f32 %v1684_v32, %v3868_v53  ;;  %v1860_v11 = vmul.f32 %v1684_v32, %v3872_v56  ;;  %v4418_v14 = vld [vmem:[#allocation9_spill] sm:$0xff] }
 0x279   : > { %v1591_v46 = vsel %vm1559_vm1, %v1558_v34, %v4415_v42  ;;  %v1717_v16 = vmul.f32 %v1685_v2, %v3874_v31  ;;  %v1861_v62 = vmul.f32 %v1685_v2, %v3876_v30  ;;  %v1655_v35 = vadd.f32 %v3854_v8, %v1619_v13 }
 0x27a   : > { %v1623_v47 = vadd.f32 %v1591_v46, %v4417_v21  ;;  %v1658_v26 = vadd.f32 %v3854_v8, %v1622_v20  ;;  %v1561_v17 = vsel %vm1559_vm1, %v1556_v52, %v1557_v49  ;;  %v1562_v10 = vsel %vm1559_vm1, %v1555_v3, %v1556_v52 }
 0x27b   : > { %v4211_v63 = vmax.f32 %v4049_v7, %v1764_v24  ;;  %v1808_v58 = vmax.f32 %v1716_v48, %v1717_v16  ;;  %v1952_v60 = vadd.f32 %v1861_v62, %v1860_v11  ;;  %v1687_v4 = vmax.f32 %v1655_v35, 0.0 }
 0x27c   : > { %v1659_v59 = vadd.f32 %v3854_v8, %v1623_v47  ;;  %v1690_v34 = vmax.f32 %v1658_v26, 0.0  ;;  %v1620_v55 = vadd.f32 %v1562_v10, %v4418_v14  ;;  %v1621_v5 = vadd.f32 %v1561_v17, %v4419_v50 }
 0x27d   : > { %v1771_v49 = vrot.slane %v4073_v27, 1  ;;  %v1809_v39 = vrot.slane %v1808_v58, 4  ;;  %v1953_v1 = vrot.slane %v1952_v60, 4  ;;  %v1719_v3 = vmul.f32 %v1687_v4, %v3874_v31 }
 0x27e   : > { %v1863_v52 = vmul.f32 %v1687_v4, %v3876_v30  ;;  %v1691_v7 = vmax.f32 %v1659_v59, 0.0  ;;  %v1722_v24 = vmul.f32 %v1690_v34, %v3868_v53  ;;  %v1866_v61 = vmul.f32 %v1690_v34, %v3872_v56 }
 0x27f   : > { %v1656_v15 = vadd.f32 %v3854_v8, %v1620_v55  ;;  %v1810_v25 = vmax.f32 %v1808_v58, %v1809_v39  ;;  %v1954_v32 = vadd.f32 %v1953_v1, %v1952_v60  ;;  %v1815_v12 = vmax.f32 %v4145_v33, %v1719_v3 }
 0x280   : > { %v1959_v13 = vadd.f32 %v1863_v52, %v4150_v29  ;;  %v1723_v2 = vmul.f32 %v1691_v7, %v3874_v31  ;;  %v1867_v51 = vmul.f32 %v1691_v7, %v3876_v30  ;;  %v1657_v42 = vadd.f32 %v3854_v8, %v1621_v5 }
 0x281   : > { %v1688_v46 = vmax.f32 %v1656_v15, 0.0  ;;  %v1811_v23 = vrot.slane %v1810_v25, 2  ;;  %v1955_v20 = vrot.slane %v1954_v32, 2  ;;  %v1816_v48 = vrot.slane %v1815_v12, 4 }
 0x282   : > { %v1960_v11 = vrot.slane %v1959_v13, 4  ;;  %v1829_v16 = vmax.f32 %v1722_v24, %v1723_v2  ;;  %v1973_v62 = vadd.f32 %v1867_v51, %v1866_v61  ;;  %v1689_v35 = vmax.f32 %v1657_v42, 0.0 }
 0x283   : > { %v1720_v21 = vmul.f32 %v1688_v46, %v3868_v53  ;;  %v1812_v47 = vmax.f32 %v1810_v25, %v1811_v23  ;;  %v1956_v33 = vadd.f32 %v1955_v20, %v1954_v32  ;;  %v1817_v26 = vmax.f32 %v1815_v12, %v1816_v48 }
 0x284   : > { %v1961_v29 = vadd.f32 %v1960_v11, %v1959_v13  ;;  %v1830_v17 = vrot.slane %v1829_v16, 4  ;;  %v1974_v10 = vrot.slane %v1973_v62, 4  ;;  %v1721_v58 = vmul.f32 %v1689_v35, %v3874_v31 }
 0x285   : > { %v1864_v8 = vmul.f32 %v1688_v46, %v3872_v56  ;;  %v1813_v60 = vrot.slane %v1812_v47, 1  ;;  %v1957_v4 = vrot.slane %v1956_v33, 1  ;;  %v1818_v59 = vrot.slane %v1817_v26, 2 }
 0x286   : > { %v1962_v34 = vrot.slane %v1961_v29, 2  ;;  %v1831_v14 = vmax.f32 %v1829_v16, %v1830_v17  ;;  %v1975_v55 = vadd.f32 %v1974_v10, %v1973_v62  ;;  %v1822_v50 = vmax.f32 %v1720_v21, %v1721_v58 }
 0x287   : > { %v1865_v5 = vmul.f32 %v1689_v35, %v3876_v30  ;;  %v1814_v53 = vmax.f32 %v1812_v47, %v1813_v60  ;;  %v1958_v39 = vadd.f32 %v1957_v4, %v1956_v33  ;;  %v1819_v1 = vmax.f32 %v1817_v26, %v1818_v59  ;;  %v4423_v26 = vld [vmem:[#allocation14_spill] sm:$0xff] }
 0x288   : > { %v1963_v3 = vadd.f32 %v1962_v34, %v1961_v29  ;;  %v1832_v52 = vrot.slane %v1831_v14, 2  ;;  %v1976_v7 = vrot.slane %v1975_v55, 2  ;;  %v1823_v24 = vrot.slane %v1822_v50, 4  ;;  %v4424_v29 = vld [vmem:[#allocation15_spill] sm:$0xff] }
 0x289   : > { %v1966_v61 = vadd.f32 %v1865_v5, %v1864_v8  ;;  %v1820_v31 = vrot.slane %v1819_v1, 1  ;;  %v1772_v56 = vmax.f32 %v4073_v27, %v1771_v49  ;;  %v4420_v25 = vrot.slane %v4090_v54, 2 }
 0x28a   : > { %v1964_v15 = vrot.slane %v1963_v3, 1  ;;  %v1824_v12 = vmax.f32 %v1822_v50, %v1823_v24  ;;  %v1833_v2 = vmax.f32 %v1831_v14, %v1832_v52  ;;  %v4421_v30 = vrot.slane %v4051_v22, 1 }
 0x28b   : > { %v1777_v32 = vmax.f32 %v4090_v54, %v4420_v25  ;;  %v1967_v13 = vrot.slane %v1966_v61, 4  ;;  %v1821_v46 = vmax.f32 %v1819_v1, %v1820_v31  ;;  %v1915_v23 = vrot.slane %v4075_v45, 1 }
 0x28c   : > { %v1909_v51 = vadd.f32 %v4421_v30, %v4051_v22  ;;  %v4422_v20 = vrot.slane %v4092_v44, 2  ;;  %v1825_v27 = vrot.slane %v1824_v12, 2  ;;  %v1834_v11 = vrot.slane %v1833_v2, 1 }
 0x28d   : > { %v1778_v42 = vrot.slane %v1777_v32, 1  ;;  %v1968_v49 = vadd.f32 %v1967_v13, %v1966_v61  ;;  %v1965_v16 = vadd.f32 %v1964_v15, %v1963_v3  ;;  %v1916_v62 = vadd.f32 %v1915_v23, %v4075_v45 }
 0x28e   : > { %v1921_v48 = vadd.f32 %v4422_v20, %v4092_v44  ;;  %v1977_v21 = vadd.f32 %v1976_v7, %v1975_v55  ;;  %v1826_v22 = vmax.f32 %v1824_v12, %v1825_v27  ;;  %v1835_v33 = vmax.f32 %v1833_v2, %v1834_v11  ;;  %v2863_v11 = vld [vmem:[%s4347_s3 + $0x88] sm:$0xff]  }
 0x28f   : > { %v1779_v54 = vmax.f32 %v1777_v32, %v1778_v42  ;;  %v1969_v47 = vrot.slane %v1968_v49, 2  ;;  %v1983_v17 = vadd.f32 %v4424_v29, %v4423_v26  ;;  %v1984_v58 = vadd.f32 %v4047_v36, %v4045_v43  ;;  %v2579_v26 = vld [vmem:[#allocation2 + $0x28] ss:$0 sm:$0xff] }
 0x290   : > { %v1922_v35 = vrot.slane %v1921_v48, 1  ;;  %v1978_v44 = vrot.slane %v1977_v21, 1  ;;  %v1985_v8 = vadd.f32 %v1909_v51, %v4211_v63  ;;  %v1827_v4 = vrot.slane %v1826_v22, 1 }
 0x291   : > { %v1970_v60 = vadd.f32 %v1969_v47, %v1968_v49  ;;  %v1986_v45 = vadd.f32 %v1916_v62, %v1772_v56  ;;  %v1991_v59 = vadd.f32 %v4195_v57, %v4186_v41  ;;  %v1992_v55 = vadd.f32 %v1958_v39, %v1814_v53  ;;  %v2862_v49 = vld [vmem:[%s4347_s3 + $0x80] sm:$0xff]   ;;  %v2865_v62 = vld [vmem:[%s4347_s3 + $0x98] sm:$0xff]  }
 0x292   : > { %v1923_v10 = vadd.f32 %v1922_v35, %v1921_v48  ;;  %v1979_v34 = vadd.f32 %v1978_v44, %v1977_v21  ;;  %v1993_v50 = vadd.f32 %v1965_v16, %v1821_v46  ;;  %v1828_v5 = vmax.f32 %v1826_v22, %v1827_v4  ;;  %v2866_v35 = vld [vmem:[%s4347_s3 + $0xa0] sm:$0xff]   ;;  %v2867_v21 = vld [vmem:[%s4347_s3 + $0xa8] sm:$0xff]   ;;  %v2868_v22 = vld [vmem:[%s4347_s3 + $0xb0] sm:$0xff]  }
 0x293   : > { %v1971_v1 = vrot.slane %v1970_v60, 1  ;;  %v1999_v3 = vsub.f32 %v1983_v17, %v1991_v59  ;;  %v2012_v52 = vmul.f32 %v4140_v28, %v3938_v18  ;;  %v2000_v43 = vsub.f32 %v1984_v58, %v1992_v55  ;;  %v2869_v47 = vld [vmem:[%s4347_s3 + $0xb8] sm:$0xff]   ;;  %v2596_v4 = vld [vmem:[#allocation2 + $0x30] ss:$0 sm:$0xff] }
 0x294   : > { %v1987_v14 = vadd.f32 %v1923_v10, %v1779_v54  ;;  %v1995_v7 = vadd.f32 %v1979_v34, %v1835_v33  ;;  %v2001_v36 = vsub.f32 %v1985_v8, %v1993_v50  ;;  %v2013_v63 = vmul.f32 %v4147_v38, %v3961_v9  ;;  %v2864_v54 = vld [vmem:[%s4347_s3 + $0x90] sm:$0xff]  }
 0x295   : > { %v1972_v24 = vadd.f32 %v1971_v1, %v1970_v60  ;;  %v2007_v61 = vand.u32 2147483647, %v1999_v3  ;;  %v2014_v41 = vmul.f32 %v4172_v0, %v3969_v6  ;;  %v2015_v57 = vmul.f32 %v1991_v59, %v1983_v17 }
 0x296   : > { %v2003_v53 = vsub.f32 %v1987_v14, %v1995_v7  ;;  %v2008_v39 = vand.u32 2147483647, %v2000_v43  ;;  %v2009_v31 = vand.u32 2147483647, %v2001_v36  ;;  %v2016_v15 = vmul.f32 %v1992_v55, %v1984_v58 }
 0x297   : > { %v1994_v56 = vadd.f32 %v1972_v24, %v1828_v5  ;;  %v2017_v25 = vmul.f32 %v1993_v50, %v1985_v8  ;;  %v2019_v32 = vmul.f32 %v1995_v7, %v1987_v14  ;;  %v2029_v18 = vsel %vm2028_vm6, %v4166_v40, %v4152_v37 }
 0x298   : > { %v2031_v9 = vsel %vm2030_vm10, %v4193_v19, %v2029_v18  ;;  %v2051_v28 = vsel %vm2028_vm6, %v2013_v63, %v2012_v52  ;;  %v2011_v40 = vand.u32 2147483647, %v2003_v53  ;;  %v4425_v16 = vmov 0.0  }
 0x299   : > { %v2002_v6 = vsub.f32 %v1986_v45, %v1994_v56  ;;  %v2018_v38 = vmul.f32 %v1994_v56, %v1986_v45  ;;  %v2033_v0 = vsel %vm2032_vm15, %v2007_v61, %v2031_v9  ;;  %v2052_v12 = vsel %vm2030_vm10, %v2014_v41, %v2051_v28 }
 0x29a   : > { %v2035_v13 = vsel %vm2034_vm4, %v2008_v39, %v2033_v0  ;;  %v2053_v2 = vsel %vm2032_vm15, %v2015_v57, %v2052_v12 }
 0x29b   : > { %v2010_v30 = vand.u32 2147483647, %v2002_v6  ;;  %v2037_v51 = vsel %vm2036_vm12, %v2009_v31, %v2035_v13  ;;  %v2054_v37 = vsel %vm2034_vm4, %v2016_v15, %v2053_v2 }
 0x29c   : > { %v2055_v19 = vsel %vm2036_vm12, %v2017_v25, %v2054_v37 }
 0x29d   : > { %v2039_v42 = vsel %vm2038_vm3, %v2010_v30, %v2037_v51  ;;  %v2056_v46 = vsel %vm2038_vm3, %v2018_v38, %v2055_v19 }
 0x29e   : > { %v2041_v23 = vsel %vm2040_vm9, %v2011_v40, %v2039_v42  ;;  %v2057_v20 = vsel %vm2040_vm9, %v2019_v32, %v2056_v46 }
 0x29f   : > { %v2107_v48 = vpack.c.bf16 %v2041_v23, %v2041_v23  ;;  %v2108_v27 = vpack.c.bf16 %v2057_v20, %v2057_v20 }
 0x2a1   : > { %2241 = vmatprep.mubr.bf16.mxu1 %v2108_v27 }
 0x2a2   : > { %2242 = vmatmul.mubr.bf16.vlgmr.msra.gmra.mrb[64].mxu1 %v2107_v48 }
 0x2a3   : > { %2713 = vmatpush3.bf16.msra.mxu1 %v2862_v49  ;;  %2728 = vmatprep.mubr.msk.bf16.mxu1 %vm2974_vm7, %v4425_v16 }
 0x2a4   : > { %2714 = vmatprep.subr.bf16.mxu1 %v4425_v16 }
 0x2a7   : > { %2715 = vmatpush3.bf16.msra.mxu1 %v2863_v11 }
 0x2a8   : > { %2716 = vmatprep.subr.bf16.mxu1 %v4425_v16 }
 0x2ab   : > { %2717 = vmatpush3.bf16.msra.mxu1 %v2864_v54 }
 0x2ac   : > { %2718 = vmatprep.subr.bf16.mxu1 %v4425_v16 }
 0x2af   : > { %2719 = vmatpush3.bf16.msra.mxu1 %v2865_v62 }
 0x2b0   : > { %2720 = vmatprep.subr.bf16.mxu1 %v4425_v16 }
 0x2b3   : > { %2721 = vmatpush3.bf16.msra.mxu1 %v2866_v35 }
 0x2b4   : > { %2722 = vmatprep.subr.bf16.mxu1 %v4425_v16 }
 0x2b7   : > { %2723 = vmatpush3.bf16.msra.mxu1 %v2867_v21 }
 0x2b8   : > { %2724 = vmatprep.subr.bf16.mxu1 %v4425_v16 }
 0x2bb   : > { %2725 = vmatpush3.bf16.msra.mxu1 %v2868_v22 }
 0x2bc   : > { %2726 = vmatprep.subr.bf16.mxu1 %v4425_v16 }
 0x2bf   : > { %2727 = vmatpush3.bf16.msra.mxu1 %v2869_v47 }
 0x375   : > { %v2649_v33 = vpop.f32.mrb[64].mxu1 }
 0x376   : > { %v2650_v29 = vpop.f32.mrb[65].mxu1 }
 0x377   : > { %v2651_v17 = vadd.f32 %v2650_v29, %v2649_v33  ;;  %v2652_v10 = vpop.f32.mrb[66].mxu1 }
 0x378   : > { %v2653_v44 = vpop.f32.mrb[67].mxu1 }
 0x379   : > { %v2244_v58 = vadd.f32 %v2651_v17, %v2579_v26 }
 0x37b   : > { %v2249_v8 = vmax.f32 %v2244_v58, 0.0 }
 0x37d   : > { %v2250_v60 = vpack.c.bf16 %v2249_v8, %v2249_v8 }
 0x37f   : > { %2729 = vmatmul.mubr.bf16.vlgmr.msra.gmra.mrb[68].mxu1 %v2250_v60 }
 0x452   : > { %v2337_v45 = vpop.f32.mrb[68].mxu1 }
 0x453   : > { %v2338_v59 = vadd.f32 %v2596_v4, %v2337_v45  ;;  %v2730_v34 = vpop.f32.mrb[69].mxu1 }
 0x454   : > { %v2340_v14 = vpop.f32.mrb[70].mxu1 }
 0x455   : > { %v2343_v55 = vmul.f32 0.5, %v2338_v59  ;;  %v2731_v50 = vpop.f32.mrb[71].mxu1 }
 0x457   : > { %2870 = vtanh.f32 %v2343_v55 }
 0x461   : > { %v2871_v5 = vpop.eup %2870 }
 0x462   : > { %v2345_v1 = vadd.f32 1.0, %v2871_v5 }
 0x464   : > { %v2346_v3 = vmul.f32 0.5, %v2345_v1 }
 0x466   : > { %2347 = vst [vmem:[%s206_s29] sm:$0xff] %v2346_v3 }
 0x467   : > { %2913 = shalt.err (!%p2910_p7)
}
 0x468   : > { %s2914_s12 = scalar_lea.hbm %s4302_s8, 128  ;;  %s2918_s20 = scalar_lea.hbm %s4348_s4, 256 }
 0x469   : > { %p2915_p8 = scmp.ne.s32.totalorder %s4302_s8, %s2914_s12  ;;  %p2919_p1 = scmp.lt.u32.totalorder %s4302_s8, %s4348_s4 }
 0x46a   : > { %p2920_p0 = scmp.lt.u32.totalorder %s2918_s20, %s2914_s12  ;;  %p2922_p6 = scmp.lt.u32.totalorder %s2914_s12, %s4302_s8 }
 0x46b   : > { %p2916_p11 = pnand %p2915_p8, %p4426_p9 }
 0x46c   : > { %p2921_p5 = por %p2920_p0, %p2919_p1 }
 0x46d   : > { %p2917_p13 = pneg %p2916_p11 }
 0x46e   : > { %p2923_p10 = por %p2922_p6, %p2921_p5 }
 0x470   : > { %p2924_p12 = pnand %p2923_p10, %p2917_p13 }
 0x472   : > { %2927 = shalt.err (!%p2924_p12)
}
 0x473   : > { %2736 = dma.vmem_to_hbm [thread:$0]  (%p4426_p9), %s4304_s5, 128, %s4302_s8, %s2349_s30  }
 0x474 PF: > { %p2748_p2 = scmp.ge.s32.totalorder %s2966_s18, 2  ;;  %s2374_s27 = sand.u32 1, %s2954_s15  }
 0x475   : > { %p4427_p3 = scmp.ne.s32.totalorder %s4361_s26, 0  ;;  %s2375_s28 = scalar_lea.sflag [#allocation4], %s2374_s27 }
 0x477   : > { %p2743_p4 = pnand %p2748_p2, %p4427_p3 }
 0x479   : > { %2949 = dma.done.wait (!%p2743_p4), %s2375_s28, 128  }
 0x47a   : > { %2951 = vsyncadd (!%p2743_p4), %s2375_s28, 4294967168  ;;  %p15_p7 = scmp.ge.s32.totalorder %s3026_s21, 4   ;;  %s4428_s15 = smov %s2958_s16 }
 0x47b   : > { %s4429_s16 = smov %s2962_s17  ;;  %s4430_s17 = smov %s3037_s24 }
 0x47c   : > { %s4431_s18 = smov %s3026_s21  ;;  %17 = sbr.rel (!%p15_p7) target bundleno = 4 (0x4), region = 76 }
 0x483   :  { %2380 = vsyncpa [#allocation3], 1 }
 0x484   :  { %2382 = vsyncpa [#allocation3 + $0x1], 1 }
 0x485   :  { %2383 = vsyncpa [#allocation4], 1 }
 0x486   :  { %2385 = vsyncpa [#allocation4 + $0x1], 1 }

</bundles_post_ra>
